<compile_context>
chip_gen: v6e
topology: v6e:2x2x1
jax: 0.10.0
libtpu: 0.0.40
codegen_flags: <defaults>
</compile_context>

<pallas_src>
import functools
import math

import jax
import jax.numpy as jnp
from jax.experimental import pallas as pl
from jax.experimental.pallas import tpu as pltpu

F_PAD = 128  # every feature / class axis is padded to one full lane width


def _round_up(v, m):
    return ((v + m - 1) // m) * m


# ----------------------------------------------------------------------------
# Kernels
# ----------------------------------------------------------------------------
def _input_proj_kernel(x_ref, w_ref, xl_ref, xr_ref):
    """xproj = x @ [W_l | W_r] for the first layer; split into xl / xr."""
    proj = jnp.dot(x_ref[...], w_ref[...], preferred_element_type=jnp.float32)
    xl_ref[...] = proj[:, :F_PAD].astype(jnp.bfloat16)
    xr_ref[...] = proj[:, F_PAD:].astype(jnp.bfloat16)


def _sage_layer_kernel(a_ref, xl_ref, xr_ref, b_ref, wnext_ref,
                       xln_ref, xrn_ref, acc_ref):
    """One SAGE layer, tiled over (row tile i, reduction tile k).

    acc[i] = sum_k A[i,k] @ xl[k]                (mean aggregation, reordered)
    at k==last:  y = relu(acc + xr[i] + b)       (lin_l(agg) + lin_r(x) + bias)
                 [xl_next | xr_next] = y @ Wcat_next   (fused next-layer proj)
    """
    k = pl.program_id(1)

    @pl.when(k == 0)
    def _():
        acc_ref[...] = jnp.zeros_like(acc_ref)

    acc_ref[...] += jnp.dot(a_ref[...], xl_ref[...],
                            preferred_element_type=jnp.float32)

    @pl.when(k == pl.num_programs(1) - 1)
    def _():
        y = acc_ref[...] + xr_ref[...].astype(jnp.float32) + b_ref[...]
        y = jnp.maximum(y, 0.0)                      # relu in f32
        proj = jnp.dot(y.astype(jnp.bfloat16), wnext_ref[...],
                       preferred_element_type=jnp.float32)
        xln_ref[...] = proj[:, :F_PAD].astype(jnp.bfloat16)
        xrn_ref[...] = proj[:, F_PAD:].astype(jnp.bfloat16)


def _pool_logsoftmax_kernel(p_ref, y_ref, out_ref, *, num_classes):
    """pooled = P @ y (global mean pool), then masked log-softmax over dim 1."""
    pooled = jnp.dot(p_ref[...], y_ref[...], preferred_element_type=jnp.float32)
    lane = jax.lax.broadcasted_iota(jnp.int32, pooled.shape, 1)
    mask = lane < num_classes
    z = jnp.where(mask, pooled, -1e30)               # kill padded class lanes
    m = jnp.max(z, axis=1, keepdims=True)
    z = z - m
    lse = jnp.log(jnp.sum(jnp.exp(z), axis=1, keepdims=True))
    out_ref[...] = jnp.where(mask, z - lse, 0.0)


# ----------------------------------------------------------------------------
# pallas_call wrappers
# ----------------------------------------------------------------------------
def _input_proj(x_pad, wcat1, *, tm, n_pad):
    return pl.pallas_call(
        _input_proj_kernel,
        out_shape=(jax.ShapeDtypeStruct((n_pad, F_PAD), jnp.bfloat16),
                   jax.ShapeDtypeStruct((n_pad, F_PAD), jnp.bfloat16)),
        grid_spec=pltpu.PrefetchScalarGridSpec(
            num_scalar_prefetch=0,
            grid=(n_pad // tm,),
            in_specs=[pl.BlockSpec((tm, F_PAD), lambda i: (i, 0)),
                      pl.BlockSpec((F_PAD, 2 * F_PAD), lambda i: (0, 0))],
            out_specs=[pl.BlockSpec((tm, F_PAD), lambda i: (i, 0)),
                       pl.BlockSpec((tm, F_PAD), lambda i: (i, 0))],
        ),
        compiler_params=pltpu.CompilerParams(
            dimension_semantics=("parallel",)),
    )(x_pad, wcat1)


def _sage_layer(a, xl, xr, bias, wnext, *, tm, tk, n_pad):
    return pl.pallas_call(
        _sage_layer_kernel,
        out_shape=(jax.ShapeDtypeStruct((n_pad, F_PAD), jnp.bfloat16),
                   jax.ShapeDtypeStruct((n_pad, F_PAD), jnp.bfloat16)),
        grid_spec=pltpu.PrefetchScalarGridSpec(
            num_scalar_prefetch=0,
            grid=(n_pad // tm, n_pad // tk),
            in_specs=[
                pl.BlockSpec((tm, tk), lambda i, k: (i, k)),           # A tile
                pl.BlockSpec((tk, F_PAD), lambda i, k: (k, 0)),        # xl (k rows)
                pl.BlockSpec((tm, F_PAD), lambda i, k: (i, 0)),        # xr (i rows)
                pl.BlockSpec((1, F_PAD), lambda i, k: (0, 0)),         # bias
                pl.BlockSpec((F_PAD, 2 * F_PAD), lambda i, k: (0, 0)),  # next Wcat
            ],
            out_specs=[
                pl.BlockSpec((tm, F_PAD), lambda i, k: (i, 0)),
                pl.BlockSpec((tm, F_PAD), lambda i, k: (i, 0)),
            ],
            scratch_shapes=[pltpu.VMEM((tm, F_PAD), jnp.float32)],
        ),
        compiler_params=pltpu.CompilerParams(
            dimension_semantics=("parallel", "arbitrary")),
    )(a, xl, xr, bias, wnext)


def _pool_logsoftmax(p, y, num_classes, g_pad):
    kernel = functools.partial(_pool_logsoftmax_kernel, num_classes=num_classes)
    vmem_spec = pl.BlockSpec(memory_space=pltpu.MemorySpace.VMEM)
    return pl.pallas_call(
        kernel,
        out_shape=jax.ShapeDtypeStruct((g_pad, F_PAD), jnp.float32),
        in_specs=[vmem_spec, vmem_spec],
        out_specs=vmem_spec,
    )(p, y)


# ----------------------------------------------------------------------------
# Host-side (jit-able) preprocessing + forward
# ----------------------------------------------------------------------------
def _build_dense_graph(x, edge_index, batch, num_graphs, n_pad, g_pad):
    n, f_in = x.shape
    src, dst = edge_index[0], edge_index[1]
    # A_count[i, j] = #edges j -> i ; mean aggregation = row-normalize (f32),
    # then cast to bf16 for MXU streaming.
    a = jnp.zeros((n_pad, n_pad), jnp.float32).at[dst, src].add(1.0)
    deg = jnp.sum(a, axis=1, keepdims=True)
    a = (a / jnp.maximum(deg, 1.0)).astype(jnp.bfloat16)

    # Pooling matrix P[g, i] = 1/|graph g| if batch[i] == g.
    onehot = (jnp.arange(g_pad, dtype=batch.dtype)[:, None]
              == batch[None, :]).astype(jnp.float32)
    counts = jnp.sum(onehot, axis=1, keepdims=True)
    p = onehot / jnp.maximum(counts, 1.0)
    p = jnp.pad(p, ((0, 0), (0, n_pad - n))).astype(jnp.bfloat16)

    x_pad = jnp.zeros((n_pad, F_PAD), jnp.bfloat16)
    x_pad = x_pad.at[:n, :f_in].set(x.astype(jnp.bfloat16))
    return a, p, x_pad


def _pack_params(params):
    """Per layer: one bf16 [128, 256] slab Wcat = [W_l | W_r] plus f32 bias.

    A trailing identity 'projection' is appended so the last layer's kernel
    simply passes its relu output through unchanged.
    """
    wcats, biases = [], []
    for (wl, b, wr) in params:
        fin, fout = wl.shape
        wc = jnp.zeros((F_PAD, 2 * F_PAD), jnp.float32)
        wc = wc.at[:fin, :fout].set(wl)
        wc = wc.at[:fin, F_PAD:F_PAD + fout].set(wr)
        wcats.append(wc.astype(jnp.bfloat16))
        bb = jnp.zeros((1, F_PAD), jnp.float32).at[0, :fout].set(b.reshape(-1))
        biases.append(bb)
    eye = jnp.zeros((F_PAD, 2 * F_PAD), jnp.float32)
    eye = eye.at[:, :F_PAD].set(jnp.eye(F_PAD, dtype=jnp.float32))
    wcats.append(eye.astype(jnp.bfloat16))
    return wcats, biases


def net_forward(x, edge_index, batch, params, num_graphs, *, tm=128, tk=128):
    """Full Net.forward (eval mode).  num_graphs must be a static Python int."""
    n = x.shape[0]
    num_classes = params[-1][0].shape[1]
    n_pad = _round_up(max(n, 1), math.lcm(128, tm, tk))
    g_pad = _round_up(num_graphs, 8)

    a, p, x_pad = _build_dense_graph(x, edge_index, batch, num_graphs,
                                     n_pad, g_pad)
    wcats, biases = _pack_params(params)

    # conv1..conv4: projection of raw x, then per-layer aggregate+combine with
    # the next layer's projection fused into the epilogue.  relu applied each
    # layer; dropout is identity in eval mode.
    xl, xr = _input_proj(x_pad, wcats[0], tm=tm, n_pad=n_pad)
    for layer in range(4):
        xl, xr = _sage_layer(a, xl, xr, biases[layer], wcats[layer + 1],
                             tm=tm, tk=tk, n_pad=n_pad)

    # global_mean_pool + log_softmax (lane-padded output, sliced on host).
    out = _pool_logsoftmax(p, xl, num_classes, g_pad)
    return out[:num_graphs, :num_classes]


def init_params(key):
    """Deterministic SAGEConv parameters for dims 56->16->32->64->2."""
    dims = [(56, 16), (16, 32), (32, 64), (64, 2)]
    params = []
    for (din, dout) in dims:
        key, k1, k2, k3 = jax.random.split(key, 4)
        scale = 1.0 / jnp.sqrt(float(din))
        wl = jax.random.uniform(k1, (din, dout), jnp.float32, -scale, scale)  # lin_l.weight^T
        b = jax.random.uniform(k2, (1, dout), jnp.float32, -scale, scale)     # lin_l.bias
        wr = jax.random.uniform(k3, (din, dout), jnp.float32, -scale, scale)  # lin_r.weight^T
        params.append((wl, b, wr))
    return params


if __name__ == "__main__":
    key = jax.random.PRNGKey(0)
    kx, ke, kp = jax.random.split(key, 3)

    N = 16           # total nodes across 2 graphs
    E = 40           # edges
    F_IN = 56        # fixed by the module (SAGEConv(56, 16))
    NUM_GRAPHS = 2   # static

    x = jax.random.normal(kx, (N, F_IN), jnp.float32)
    edge_index = jax.random.randint(ke, (2, E), 0, N, jnp.int32)
    batch = jnp.concatenate([jnp.zeros(8, jnp.int32), jnp.ones(8, jnp.int32)])

    params = init_params(kp)

    fwd = jax.jit(lambda xx, ei, bb: net_forward(xx, ei, bb, params, NUM_GRAPHS))
    out = jax.block_until_ready(fwd(x, edge_index, batch))

    # Sanity: output is per-graph log-probabilities over 2 classes.
    assert out.shape == (NUM_GRAPHS, 2)
    assert bool(jnp.all(jnp.isfinite(out)))
    assert bool(jnp.allclose(jnp.sum(jnp.exp(out), axis=1), 1.0, atol=1e-5))

    print("KERNEL_OK")
</pallas_src>

<mosaic_0001>
module attributes {stable_mosaic.version = 11 : i64} {
  func.func private @main(%arg0: i32) attributes {dimension_semantics = [#tpu.dimension_semantics<core_parallel>], iteration_bounds = array<i64: 2>, tpu.core_type = #tpu.core_type<sc_scalar_subcore>, window_params = []} {
    return
  }
}

module attributes {stable_mosaic.version = 11 : i64} {
  func.func private @main(%arg0: i32) attributes {dimension_semantics = [#tpu.dimension_semantics<core_parallel>], iteration_bounds = array<i64: 2>, tpu.core_type = #tpu.core_type<sc_scalar_subcore>, window_params = []} {
    return
  }
}

module attributes {stable_mosaic.version = 11 : i64} {
  func.func @_input_proj_kernel(%arg0: i32, %arg1: memref<128x128xbf16, #tpu.memory_space<vmem>>, %arg2: memref<128x256xbf16, #tpu.memory_space<vmem>>, %arg3: memref<128x128xbf16, #tpu.memory_space<vmem>>, %arg4: memref<128x128xbf16, #tpu.memory_space<vmem>>) attributes {dimension_semantics = [#tpu.dimension_semantics<parallel>], iteration_bounds = array<i64: 1>, scalar_prefetch = 0 : i64, scratch_operands = 0 : i64, tpu.core_type = #tpu.core_type<tc>, window_params = [{transform_indices = @transform_0, window_bounds = array<i64: 128, 128>}, {pipeline_mode = #tpu.pipeline_mode<synchronous>, transform_indices = @transform_1, window_bounds = array<i64: 128, 256>}, {transform_indices = @transform_2, window_bounds = array<i64: 128, 128>}, {transform_indices = @transform_3, window_bounds = array<i64: 128, 128>}]} {
    %c0 = arith.constant 0 : index
    %c0_0 = arith.constant 0 : index
    %0 = vector.load %arg1[%c0, %c0_0] : memref<128x128xbf16, #tpu.memory_space<vmem>>, vector<128x128xbf16>
    %c0_1 = arith.constant 0 : index
    %c0_2 = arith.constant 0 : index
    %1 = vector.load %arg2[%c0_1, %c0_2] : memref<128x256xbf16, #tpu.memory_space<vmem>>, vector<128x256xbf16>
    %cst = arith.constant dense<0.000000e+00> : vector<128x256xf32>
    %2 = tpu.matmul %0, %1, %cst {dimension_numbers = #tpu.dot_dimension_numbers<[1], [0], [0], [1], [0, 0, 1, 1], [], []>} : vector<128x128xbf16>, vector<128x256xbf16>, vector<128x256xf32> -> vector<128x256xf32>
    %3 = vector.extract_strided_slice %2 {offsets = [0, 0], sizes = [128, 128], strides = [1, 1]} : vector<128x256xf32> to vector<128x128xf32>
    %4 = arith.truncf %3 : vector<128x128xf32> to vector<128x128xbf16>
    %c0_3 = arith.constant 0 : index
    %c0_4 = arith.constant 0 : index
    %5 = vector.load %arg3[%c0_3, %c0_4] : memref<128x128xbf16, #tpu.memory_space<vmem>>, vector<128x128xbf16>
    tpu.vector_store %arg3[%c0_3, %c0_4], %4 {strides = array<i32>} : memref<128x128xbf16, #tpu.memory_space<vmem>>, vector<128x128xbf16>,
    %6 = vector.extract_strided_slice %2 {offsets = [0, 128], sizes = [128, 128], strides = [1, 1]} : vector<128x256xf32> to vector<128x128xf32>
    %7 = arith.truncf %6 : vector<128x128xf32> to vector<128x128xbf16>
    %c0_5 = arith.constant 0 : index
    %c0_6 = arith.constant 0 : index
    %8 = vector.load %arg4[%c0_5, %c0_6] : memref<128x128xbf16, #tpu.memory_space<vmem>>, vector<128x128xbf16>
    tpu.vector_store %arg4[%c0_5, %c0_6], %7 {strides = array<i32>} : memref<128x128xbf16, #tpu.memory_space<vmem>>, vector<128x128xbf16>,
    return
  }
  func.func @transform_0(%arg0: i32) -> (i32, i32) {
    %c0_i32 = arith.constant 0 : i32
    %c0_i32_0 = arith.constant 0 : i32
    return %arg0, %c0_i32 : i32, i32
  }
  func.func @transform_1(%arg0: i32) -> (i32, i32) {
    %c0_i32 = arith.constant 0 : i32
    %c0_i32_0 = arith.constant 0 : i32
    %c0_i32_1 = arith.constant 0 : i32
    return %c0_i32, %c0_i32_0 : i32, i32
  }
  func.func @transform_2(%arg0: i32) -> (i32, i32) {
    %c0_i32 = arith.constant 0 : i32
    %c0_i32_0 = arith.constant 0 : i32
    return %arg0, %c0_i32 : i32, i32
  }
  func.func @transform_3(%arg0: i32) -> (i32, i32) {
    %c0_i32 = arith.constant 0 : i32
    %c0_i32_0 = arith.constant 0 : i32
    return %arg0, %c0_i32 : i32, i32
  }
}

module attributes {stable_mosaic.version = 11 : i64} {
  func.func @_sage_layer_kernel(%arg0: i32, %arg1: i32, %arg2: memref<128x128xbf16, #tpu.memory_space<vmem>>, %arg3: memref<128x128xbf16, #tpu.memory_space<vmem>>, %arg4: memref<128x128xbf16, #tpu.memory_space<vmem>>, %arg5: memref<1x128xf32, #tpu.memory_space<vmem>>, %arg6: memref<128x256xbf16, #tpu.memory_space<vmem>>, %arg7: memref<128x128xbf16, #tpu.memory_space<vmem>>, %arg8: memref<128x128xbf16, #tpu.memory_space<vmem>>, %arg9: memref<128x128xf32, #tpu.memory_space<vmem>>) attributes {dimension_semantics = [#tpu.dimension_semantics<parallel>, #tpu.dimension_semantics<arbitrary>], iteration_bounds = array<i64: 1, 1>, scalar_prefetch = 0 : i64, scratch_operands = 1 : i64, tpu.core_type = #tpu.core_type<tc>, window_params = [{transform_indices = @transform_0, window_bounds = array<i64: 128, 128>}, {transform_indices = @transform_1, window_bounds = array<i64: 128, 128>}, {transform_indices = @transform_2, window_bounds = array<i64: 128, 128>}, {pipeline_mode = #tpu.pipeline_mode<synchronous>, transform_indices = @transform_3, window_bounds = array<i64: 1, 128>}, {pipeline_mode = #tpu.pipeline_mode<synchronous>, transform_indices = @transform_4, window_bounds = array<i64: 128, 256>}, {transform_indices = @transform_5, window_bounds = array<i64: 128, 128>}, {transform_indices = @transform_6, window_bounds = array<i64: 128, 128>}]} {
    %c0_i32 = arith.constant 0 : i32
    %0 = arith.cmpi eq, %arg1, %c0_i32 : i32
    %1 = arith.extui %0 : i1 to i32
    %c0_i32_0 = arith.constant 0 : i32
    %2 = arith.cmpi ne, %1, %c0_i32_0 : i32
    scf.if %2 {
      %cst_10 = arith.constant 0.000000e+00 : f32
      %12 = vector.broadcast %cst_10 : f32 to vector<128x128xf32>
      %c0_11 = arith.constant 0 : index
      %c0_12 = arith.constant 0 : index
      %13 = vector.load %arg9[%c0_11, %c0_12] : memref<128x128xf32, #tpu.memory_space<vmem>>, vector<128x128xf32>
      tpu.vector_store %arg9[%c0_11, %c0_12], %12 {strides = array<i32>} : memref<128x128xf32, #tpu.memory_space<vmem>>, vector<128x128xf32>,
    } else {
    }
    %c0 = arith.constant 0 : index
    %c0_1 = arith.constant 0 : index
    %3 = vector.load %arg9[%c0, %c0_1] : memref<128x128xf32, #tpu.memory_space<vmem>>, vector<128x128xf32>
    %c0_2 = arith.constant 0 : index
    %c0_3 = arith.constant 0 : index
    %4 = vector.load %arg2[%c0_2, %c0_3] : memref<128x128xbf16, #tpu.memory_space<vmem>>, vector<128x128xbf16>
    %c0_4 = arith.constant 0 : index
    %c0_5 = arith.constant 0 : index
    %5 = vector.load %arg3[%c0_4, %c0_5] : memref<128x128xbf16, #tpu.memory_space<vmem>>, vector<128x128xbf16>
    %cst = arith.constant dense<0.000000e+00> : vector<128x128xf32>
    %6 = tpu.matmul %4, %5, %cst {dimension_numbers = #tpu.dot_dimension_numbers<[1], [0], [0], [1], [0, 0, 1, 1], [], []>} : vector<128x128xbf16>, vector<128x128xbf16>, vector<128x128xf32> -> vector<128x128xf32>
    %7 = arith.addf %3, %6 : vector<128x128xf32>
    %c0_6 = arith.constant 0 : index
    %c0_7 = arith.constant 0 : index
    %8 = vector.load %arg9[%c0_6, %c0_7] : memref<128x128xf32, #tpu.memory_space<vmem>>, vector<128x128xf32>
    tpu.vector_store %arg9[%c0_6, %c0_7], %7 {strides = array<i32>} : memref<128x128xf32, #tpu.memory_space<vmem>>, vector<128x128xf32>,
    %c0_i32_8 = arith.constant 0 : i32
    %9 = arith.cmpi eq, %arg1, %c0_i32_8 : i32
    %10 = arith.extui %9 : i1 to i32
    %c0_i32_9 = arith.constant 0 : i32
    %11 = arith.cmpi ne, %10, %c0_i32_9 : i32
    scf.if %11 {
      %c0_10 = arith.constant 0 : index
      %c0_11 = arith.constant 0 : index
      %12 = vector.load %arg9[%c0_10, %c0_11] : memref<128x128xf32, #tpu.memory_space<vmem>>, vector<128x128xf32>
      %c0_12 = arith.constant 0 : index
      %c0_13 = arith.constant 0 : index
      %13 = vector.load %arg4[%c0_12, %c0_13] : memref<128x128xbf16, #tpu.memory_space<vmem>>, vector<128x128xbf16>
      %14 = arith.extf %13 : vector<128x128xbf16> to vector<128x128xf32>
      %15 = arith.addf %12, %14 : vector<128x128xf32>
      %c0_14 = arith.constant 0 : index
      %c0_15 = arith.constant 0 : index
      %16 = vector.load %arg5[%c0_14, %c0_15] : memref<1x128xf32, #tpu.memory_space<vmem>>, vector<1x128xf32>
      %17 = vector.broadcast %16 : vector<1x128xf32> to vector<128x128xf32>
      %18 = arith.addf %15, %17 : vector<128x128xf32>
      %cst_16 = arith.constant 0.000000e+00 : f32
      %19 = vector.broadcast %cst_16 : f32 to vector<128x128xf32>
      %20 = arith.maximumf %18, %19 : vector<128x128xf32>
      %21 = arith.truncf %20 : vector<128x128xf32> to vector<128x128xbf16>
      %c0_17 = arith.constant 0 : index
      %c0_18 = arith.constant 0 : index
      %22 = vector.load %arg6[%c0_17, %c0_18] : memref<128x256xbf16, #tpu.memory_space<vmem>>, vector<128x256xbf16>
      %cst_19 = arith.constant dense<0.000000e+00> : vector<128x256xf32>
      %23 = tpu.matmul %21, %22, %cst_19 {dimension_numbers = #tpu.dot_dimension_numbers<[1], [0], [0], [1], [0, 0, 1, 1], [], []>} : vector<128x128xbf16>, vector<128x256xbf16>, vector<128x256xf32> -> vector<128x256xf32>
      %24 = vector.extract_strided_slice %23 {offsets = [0, 0], sizes = [128, 128], strides = [1, 1]} : vector<128x256xf32> to vector<128x128xf32>
      %25 = arith.truncf %24 : vector<128x128xf32> to vector<128x128xbf16>
      %c0_20 = arith.constant 0 : index
      %c0_21 = arith.constant 0 : index
      %26 = vector.load %arg7[%c0_20, %c0_21] : memref<128x128xbf16, #tpu.memory_space<vmem>>, vector<128x128xbf16>
      tpu.vector_store %arg7[%c0_20, %c0_21], %25 {strides = array<i32>} : memref<128x128xbf16, #tpu.memory_space<vmem>>, vector<128x128xbf16>,
      %27 = vector.extract_strided_slice %23 {offsets = [0, 128], sizes = [128, 128], strides = [1, 1]} : vector<128x256xf32> to vector<128x128xf32>
      %28 = arith.truncf %27 : vector<128x128xf32> to vector<128x128xbf16>
      %c0_22 = arith.constant 0 : index
      %c0_23 = arith.constant 0 : index
      %29 = vector.load %arg8[%c0_22, %c0_23] : memref<128x128xbf16, #tpu.memory_space<vmem>>, vector<128x128xbf16>
      tpu.vector_store %arg8[%c0_22, %c0_23], %28 {strides = array<i32>} : memref<128x128xbf16, #tpu.memory_space<vmem>>, vector<128x128xbf16>,
    } else {
    }
    return
  }
  func.func @transform_0(%arg0: i32, %arg1: i32) -> (i32, i32) {
    %c0_i32 = arith.constant 0 : i32
    return %arg0, %arg1 : i32, i32
  }
  func.func @transform_1(%arg0: i32, %arg1: i32) -> (i32, i32) {
    %c0_i32 = arith.constant 0 : i32
    %c0_i32_0 = arith.constant 0 : i32
    return %arg1, %c0_i32 : i32, i32
  }
  func.func @transform_2(%arg0: i32, %arg1: i32) -> (i32, i32) {
    %c0_i32 = arith.constant 0 : i32
    %c0_i32_0 = arith.constant 0 : i32
    return %arg0, %c0_i32 : i32, i32
  }
  func.func @transform_3(%arg0: i32, %arg1: i32) -> (i32, i32) {
    %c0_i32 = arith.constant 0 : i32
    %c0_i32_0 = arith.constant 0 : i32
    %c0_i32_1 = arith.constant 0 : i32
    return %c0_i32, %c0_i32_0 : i32, i32
  }
  func.func @transform_4(%arg0: i32, %arg1: i32) -> (i32, i32) {
    %c0_i32 = arith.constant 0 : i32
    %c0_i32_0 = arith.constant 0 : i32
    %c0_i32_1 = arith.constant 0 : i32
    return %c0_i32, %c0_i32_0 : i32, i32
  }
  func.func @transform_5(%arg0: i32, %arg1: i32) -> (i32, i32) {
    %c0_i32 = arith.constant 0 : i32
    %c0_i32_0 = arith.constant 0 : i32
    return %arg0, %c0_i32 : i32, i32
  }
  func.func @transform_6(%arg0: i32, %arg1: i32) -> (i32, i32) {
    %c0_i32 = arith.constant 0 : i32
    %c0_i32_0 = arith.constant 0 : i32
    return %arg0, %c0_i32 : i32, i32
  }
}

module attributes {stable_mosaic.version = 11 : i64} {
  func.func @_pool_logsoftmax_kernel(%arg0: memref<8x128xbf16, #tpu.memory_space<vmem>>, %arg1: memref<128x128xbf16, #tpu.memory_space<vmem>>, %arg2: memref<8x128xf32, #tpu.memory_space<vmem>>) attributes {dimension_semantics = [], scalar_prefetch = 0 : i64, scratch_operands = 0 : i64, tpu.core_type = #tpu.core_type<tc>} {
    %c0 = arith.constant 0 : index
    %c0_0 = arith.constant 0 : index
    %0 = vector.load %arg0[%c0, %c0_0] : memref<8x128xbf16, #tpu.memory_space<vmem>>, vector<8x128xbf16>
    %c0_1 = arith.constant 0 : index
    %c0_2 = arith.constant 0 : index
    %1 = vector.load %arg1[%c0_1, %c0_2] : memref<128x128xbf16, #tpu.memory_space<vmem>>, vector<128x128xbf16>
    %cst = arith.constant dense<0.000000e+00> : vector<8x128xf32>
    %2 = tpu.matmul %0, %1, %cst {dimension_numbers = #tpu.dot_dimension_numbers<[1], [0], [0], [1], [0, 0, 1, 1], [], []>} : vector<8x128xbf16>, vector<128x128xbf16>, vector<8x128xf32> -> vector<8x128xf32>
    %3 = tpu.iota {dimensions = array<i32: 1>} : vector<8x128xi32>
    %c2_i32 = arith.constant 2 : i32
    %4 = vector.broadcast %c2_i32 : i32 to vector<8x128xi32>
    %5 = arith.cmpi slt, %3, %4 : vector<8x128xi32>
    %cst_3 = arith.constant -1.000000e+30 : f32
    %6 = vector.broadcast %cst_3 : f32 to vector<8x128xf32>
    %7 = arith.select %5, %2, %6 : vector<8x128xi1>, vector<8x128xf32>
    %cst_4 = arith.constant dense<0xFF800000> : vector<8xf32>
    %8 = vector.multi_reduction <maximumf>, %7, %cst_4 [1] : vector<8x128xf32> to vector<8xf32>
    %9 = vector.shape_cast %8 : vector<8xf32> to vector<8x1xf32>
    %10 = vector.broadcast %9 : vector<8x1xf32> to vector<8x128xf32>
    %11 = arith.subf %7, %10 : vector<8x128xf32>
    %12 = math.exp %11 : vector<8x128xf32>
    %cst_5 = arith.constant dense<0.000000e+00> : vector<8xf32>
    %13 = vector.multi_reduction <add>, %12, %cst_5 [1] : vector<8x128xf32> to vector<8xf32>
    %14 = vector.shape_cast %13 : vector<8xf32> to vector<8x1xf32>
    %15 = math.log %14 : vector<8x1xf32>
    %16 = vector.broadcast %15 : vector<8x1xf32> to vector<8x128xf32>
    %17 = arith.subf %11, %16 : vector<8x128xf32>
    %cst_6 = arith.constant 0.000000e+00 : f32
    %18 = vector.broadcast %cst_6 : f32 to vector<8x128xf32>
    %19 = arith.select %5, %17, %18 : vector<8x128xi1>, vector<8x128xf32>
    %c0_7 = arith.constant 0 : index
    %c0_8 = arith.constant 0 : index
    %20 = vector.load %arg2[%c0_7, %c0_8] : memref<8x128xf32, #tpu.memory_space<vmem>>, vector<8x128xf32>
    tpu.vector_store %arg2[%c0_7, %c0_8], %19 {strides = array<i32>} : memref<8x128xf32, #tpu.memory_space<vmem>>, vector<8x128xf32>,
    return
  }
}

module attributes {stable_mosaic.version = 11 : i64} {
  func.func @_sage_layer_kernel(%arg0: i32, %arg1: i32, %arg2: memref<128x128xbf16, #tpu.memory_space<vmem>>, %arg3: memref<128x128xbf16, #tpu.memory_space<vmem>>, %arg4: memref<128x128xbf16, #tpu.memory_space<vmem>>, %arg5: memref<1x128xf32, #tpu.memory_space<vmem>>, %arg6: memref<128x256xbf16, #tpu.memory_space<vmem>>, %arg7: memref<128x128xbf16, #tpu.memory_space<vmem>>, %arg8: memref<128x128xbf16, #tpu.memory_space<vmem>>, %arg9: memref<128x128xf32, #tpu.memory_space<vmem>>) attributes {dimension_semantics = [#tpu.dimension_semantics<parallel>, #tpu.dimension_semantics<arbitrary>], iteration_bounds = array<i64: 1, 1>, scalar_prefetch = 0 : i64, scratch_operands = 1 : i64, tpu.core_type = #tpu.core_type<tc>, window_params = [{transform_indices = @transform_0, window_bounds = array<i64: 128, 128>}, {transform_indices = @transform_1, window_bounds = array<i64: 128, 128>}, {transform_indices = @transform_2, window_bounds = array<i64: 128, 128>}, {pipeline_mode = #tpu.pipeline_mode<synchronous>, transform_indices = @transform_3, window_bounds = array<i64: 1, 128>}, {pipeline_mode = #tpu.pipeline_mode<synchronous>, transform_indices = @transform_4, window_bounds = array<i64: 128, 256>}, {transform_indices = @transform_5, window_bounds = array<i64: 128, 128>}, {transform_indices = @transform_6, window_bounds = array<i64: 128, 128>}]} {
    %c0_i32 = arith.constant 0 : i32
    %0 = arith.cmpi eq, %arg1, %c0_i32 : i32
    %1 = arith.extui %0 : i1 to i32
    %c0_i32_0 = arith.constant 0 : i32
    %2 = arith.cmpi ne, %1, %c0_i32_0 : i32
    scf.if %2 {
      %cst_10 = arith.constant 0.000000e+00 : f32
      %12 = vector.broadcast %cst_10 : f32 to vector<128x128xf32>
      %c0_11 = arith.constant 0 : index
      %c0_12 = arith.constant 0 : index
      %13 = vector.load %arg9[%c0_11, %c0_12] : memref<128x128xf32, #tpu.memory_space<vmem>>, vector<128x128xf32>
      tpu.vector_store %arg9[%c0_11, %c0_12], %12 {strides = array<i32>} : memref<128x128xf32, #tpu.memory_space<vmem>>, vector<128x128xf32>,
    } else {
    }
    %c0 = arith.constant 0 : index
    %c0_1 = arith.constant 0 : index
    %3 = vector.load %arg9[%c0, %c0_1] : memref<128x128xf32, #tpu.memory_space<vmem>>, vector<128x128xf32>
    %c0_2 = arith.constant 0 : index
    %c0_3 = arith.constant 0 : index
    %4 = vector.load %arg2[%c0_2, %c0_3] : memref<128x128xbf16, #tpu.memory_space<vmem>>, vector<128x128xbf16>
    %c0_4 = arith.constant 0 : index
    %c0_5 = arith.constant 0 : index
    %5 = vector.load %arg3[%c0_4, %c0_5] : memref<128x128xbf16, #tpu.memory_space<vmem>>, vector<128x128xbf16>
    %cst = arith.constant dense<0.000000e+00> : vector<128x128xf32>
    %6 = tpu.matmul %4, %5, %cst {dimension_numbers = #tpu.dot_dimension_numbers<[1], [0], [0], [1], [0, 0, 1, 1], [], []>} : vector<128x128xbf16>, vector<128x128xbf16>, vector<128x128xf32> -> vector<128x128xf32>
    %7 = arith.addf %3, %6 : vector<128x128xf32>
    %c0_6 = arith.constant 0 : index
    %c0_7 = arith.constant 0 : index
    %8 = vector.load %arg9[%c0_6, %c0_7] : memref<128x128xf32, #tpu.memory_space<vmem>>, vector<128x128xf32>
    tpu.vector_store %arg9[%c0_6, %c0_7], %7 {strides = array<i32>} : memref<128x128xf32, #tpu.memory_space<vmem>>, vector<128x128xf32>,
    %c0_i32_8 = arith.constant 0 : i32
    %9 = arith.cmpi eq, %arg1, %c0_i32_8 : i32
    %10 = arith.extui %9 : i1 to i32
    %c0_i32_9 = arith.constant 0 : i32
    %11 = arith.cmpi ne, %10, %c0_i32_9 : i32
    scf.if %11 {
      %c0_10 = arith.constant 0 : index
      %c0_11 = arith.constant 0 : index
      %12 = vector.load %arg9[%c0_10, %c0_11] : memref<128x128xf32, #tpu.memory_space<vmem>>, vector<128x128xf32>
      %c0_12 = arith.constant 0 : index
      %c0_13 = arith.constant 0 : index
      %13 = vector.load %arg4[%c0_12, %c0_13] : memref<128x128xbf16, #tpu.memory_space<vmem>>, vector<128x128xbf16>
      %14 = arith.extf %13 : vector<128x128xbf16> to vector<128x128xf32>
      %15 = arith.addf %12, %14 : vector<128x128xf32>
      %c0_14 = arith.constant 0 : index
      %c0_15 = arith.constant 0 : index
      %16 = vector.load %arg5[%c0_14, %c0_15] : memref<1x128xf32, #tpu.memory_space<vmem>>, vector<1x128xf32>
      %17 = vector.broadcast %16 : vector<1x128xf32> to vector<128x128xf32>
      %18 = arith.addf %15, %17 : vector<128x128xf32>
      %cst_16 = arith.constant 0.000000e+00 : f32
      %19 = vector.broadcast %cst_16 : f32 to vector<128x128xf32>
      %20 = arith.maximumf %18, %19 : vector<128x128xf32>
      %21 = arith.truncf %20 : vector<128x128xf32> to vector<128x128xbf16>
      %c0_17 = arith.constant 0 : index
      %c0_18 = arith.constant 0 : index
      %22 = vector.load %arg6[%c0_17, %c0_18] : memref<128x256xbf16, #tpu.memory_space<vmem>>, vector<128x256xbf16>
      %cst_19 = arith.constant dense<0.000000e+00> : vector<128x256xf32>
      %23 = tpu.matmul %21, %22, %cst_19 {dimension_numbers = #tpu.dot_dimension_numbers<[1], [0], [0], [1], [0, 0, 1, 1], [], []>} : vector<128x128xbf16>, vector<128x256xbf16>, vector<128x256xf32> -> vector<128x256xf32>
      %24 = vector.extract_strided_slice %23 {offsets = [0, 0], sizes = [128, 128], strides = [1, 1]} : vector<128x256xf32> to vector<128x128xf32>
      %25 = arith.truncf %24 : vector<128x128xf32> to vector<128x128xbf16>
      %c0_20 = arith.constant 0 : index
      %c0_21 = arith.constant 0 : index
      %26 = vector.load %arg7[%c0_20, %c0_21] : memref<128x128xbf16, #tpu.memory_space<vmem>>, vector<128x128xbf16>
      tpu.vector_store %arg7[%c0_20, %c0_21], %25 {strides = array<i32>} : memref<128x128xbf16, #tpu.memory_space<vmem>>, vector<128x128xbf16>,
      %27 = vector.extract_strided_slice %23 {offsets = [0, 128], sizes = [128, 128], strides = [1, 1]} : vector<128x256xf32> to vector<128x128xf32>
      %28 = arith.truncf %27 : vector<128x128xf32> to vector<128x128xbf16>
      %c0_22 = arith.constant 0 : index
      %c0_23 = arith.constant 0 : index
      %29 = vector.load %arg8[%c0_22, %c0_23] : memref<128x128xbf16, #tpu.memory_space<vmem>>, vector<128x128xbf16>
      tpu.vector_store %arg8[%c0_22, %c0_23], %28 {strides = array<i32>} : memref<128x128xbf16, #tpu.memory_space<vmem>>, vector<128x128xbf16>,
    } else {
    }
    return
  }
  func.func @transform_0(%arg0: i32, %arg1: i32) -> (i32, i32) {
    %c0_i32 = arith.constant 0 : i32
    return %arg0, %arg1 : i32, i32
  }
  func.func @transform_1(%arg0: i32, %arg1: i32) -> (i32, i32) {
    %c0_i32 = arith.constant 0 : i32
    %c0_i32_0 = arith.constant 0 : i32
    return %arg1, %c0_i32 : i32, i32
  }
  func.func @transform_2(%arg0: i32, %arg1: i32) -> (i32, i32) {
    %c0_i32 = arith.constant 0 : i32
    %c0_i32_0 = arith.constant 0 : i32
    return %arg0, %c0_i32 : i32, i32
  }
  func.func @transform_3(%arg0: i32, %arg1: i32) -> (i32, i32) {
    %c0_i32 = arith.constant 0 : i32
    %c0_i32_0 = arith.constant 0 : i32
    %c0_i32_1 = arith.constant 0 : i32
    return %c0_i32, %c0_i32_0 : i32, i32
  }
  func.func @transform_4(%arg0: i32, %arg1: i32) -> (i32, i32) {
    %c0_i32 = arith.constant 0 : i32
    %c0_i32_0 = arith.constant 0 : i32
    %c0_i32_1 = arith.constant 0 : i32
    return %c0_i32, %c0_i32_0 : i32, i32
  }
  func.func @transform_5(%arg0: i32, %arg1: i32) -> (i32, i32) {
    %c0_i32 = arith.constant 0 : i32
    %c0_i32_0 = arith.constant 0 : i32
    return %arg0, %c0_i32 : i32, i32
  }
  func.func @transform_6(%arg0: i32, %arg1: i32) -> (i32, i32) {
    %c0_i32 = arith.constant 0 : i32
    %c0_i32_0 = arith.constant 0 : i32
    return %arg0, %c0_i32 : i32, i32
  }
}

</mosaic_0001>

<bundles_post_ra>
// kernel: _lambda_.6
= control target key start
LH: loop header
LB: loop body
LE: loop exit
PB: predicated region body
PF: predicated region fallthrough
CT: control target
= control target key end

     0   :  { %v686_v1 = vmov 0   ;;  %s835_s1 = inlined_call_operand.vmem [shape: bf16[128,256], index: 1, kind: input, shape index: {}]   ;;  %s836_s0 = inlined_call_operand.vmem [shape: bf16[128,128], index: 0, kind: input, shape index: {}]   ;;  %s837_s2 = inlined_call_operand.vmem [shape: bf16[128,128], index: 2, kind: output, shape index: {0}]   ;;  %s838_s3 = inlined_call_operand.vmem [shape: bf16[128,128], index: 3, kind: output, shape index: {1}]  }
   0x1   :  { %v654_v0 = vld [vmem:[%s835_s1 + $0x74] ss:$8 sps:$4 sm:$0xff]   ;;  %206 = vmatprep.mubr.bf16.mxu0 %v686_v1  ;;  %246 = vmatprep.mubr.bf16.mxu1 %v686_v1  ;;  %v656_v2 = vld [vmem:[%s835_s1 + $0x70] ss:$8 sps:$4 sm:$0xff]   ;;  %v657_v3 = vld [vmem:[%s835_s1 + $0x64] ss:$8 sps:$4 sm:$0xff]  }
   0x2   :  { %174 = vmatprep.subr.bf16.mxu0 %v654_v0  ;;  %637 = vmatprep.subr.bf16.mxu1 %v654_v0  ;;  %v659_v4 = vld [vmem:[%s835_s1 + $0x60] ss:$8 sps:$4 sm:$0xff]   ;;  %v660_v5 = vld [vmem:[%s835_s1 + $0x54] ss:$8 sps:$4 sm:$0xff]   ;;  %v662_v6 = vld [vmem:[%s835_s1 + $0x50] ss:$8 sps:$4 sm:$0xff]  }
   0x3   :  { %175 = vmatpush1.bf16.msra.mxu0 %v656_v2  ;;  %645 = vmatpush1.bf16.msra.mxu1 %v656_v2  ;;  %v663_v7 = vld [vmem:[%s835_s1 + $0x44] ss:$8 sps:$4 sm:$0xff]   ;;  %v665_v8 = vld [vmem:[%s835_s1 + $0x40] ss:$8 sps:$4 sm:$0xff]   ;;  %v666_v9 = vld [vmem:[%s835_s1 + $0x34] ss:$8 sps:$4 sm:$0xff]  }
   0x4   :  { %176 = vmatprep.subr.bf16.mxu0 %v657_v3  ;;  %638 = vmatprep.subr.bf16.mxu1 %v657_v3  ;;  %v668_v10 = vld [vmem:[%s835_s1 + $0x30] ss:$8 sps:$4 sm:$0xff]   ;;  %v669_v11 = vld [vmem:[%s835_s1 + $0x24] ss:$8 sps:$4 sm:$0xff]   ;;  %v671_v12 = vld [vmem:[%s835_s1 + $0x20] ss:$8 sps:$4 sm:$0xff]  }
   0x5   :  { %v672_v13 = vld [vmem:[%s835_s1 + $0x14] ss:$8 sps:$4 sm:$0xff]   ;;  %v674_v14 = vld [vmem:[%s835_s1 + $0x10] ss:$8 sps:$4 sm:$0xff]   ;;  %v675_v15 = vld [vmem:[%s835_s1 + $0x4] ss:$8 sps:$4 sm:$0xff]  }
   0x6   :  { %v677_v16 = vld [vmem:[%s835_s1] ss:$8 sps:$4 sm:$0xff]   ;;  %v682_v21 = vld [vmem:[%s836_s0 + $0x10] sm:$0xff]   ;;  %v684_v23 = vld [vmem:[%s836_s0 + $0x18] sm:$0xff]  }
   0x7   :  { %177 = vmatpush1.bf16.msra.mxu0 %v659_v4  ;;  %646 = vmatpush1.bf16.msra.mxu1 %v659_v4  ;;  %v678_v17 = vld [vmem:[%s836_s0] sm:$0xff]   ;;  %v680_v19 = vld [vmem:[%s836_s0 + $0x8] sm:$0xff]   ;;  %v683_v22 = vld [vmem:[%s836_s0 + $0x30] sm:$0xff]  }
   0x8   :  { %178 = vmatprep.subr.bf16.mxu0 %v660_v5  ;;  %639 = vmatprep.subr.bf16.mxu1 %v660_v5  ;;  %v679_v18 = vld [vmem:[%s836_s0 + $0x20] sm:$0xff]   ;;  %v681_v20 = vld [vmem:[%s836_s0 + $0x28] sm:$0xff]   ;;  %v685_v24 = vld [vmem:[%s836_s0 + $0x38] sm:$0xff]  }
   0xb   :  { %179 = vmatpush1.bf16.msra.mxu0 %v662_v6  ;;  %647 = vmatpush1.bf16.msra.mxu1 %v662_v6 }
   0xc   :  { %180 = vmatprep.subr.bf16.mxu0 %v663_v7  ;;  %640 = vmatprep.subr.bf16.mxu1 %v663_v7 }
   0xf   :  { %181 = vmatpush1.bf16.msra.mxu0 %v665_v8  ;;  %648 = vmatpush1.bf16.msra.mxu1 %v665_v8 }
  0x10   :  { %182 = vmatprep.subr.bf16.mxu0 %v666_v9  ;;  %641 = vmatprep.subr.bf16.mxu1 %v666_v9 }
  0x13   :  { %183 = vmatpush1.bf16.msra.mxu0 %v668_v10  ;;  %649 = vmatpush1.bf16.msra.mxu1 %v668_v10 }
  0x14   :  { %184 = vmatprep.subr.bf16.mxu0 %v669_v11  ;;  %642 = vmatprep.subr.bf16.mxu1 %v669_v11 }
  0x17   :  { %185 = vmatpush1.bf16.msra.mxu0 %v671_v12  ;;  %650 = vmatpush1.bf16.msra.mxu1 %v671_v12 }
  0x18   :  { %186 = vmatprep.subr.bf16.mxu0 %v672_v13  ;;  %643 = vmatprep.subr.bf16.mxu1 %v672_v13 }
  0x1b   :  { %187 = vmatpush1.bf16.msra.mxu0 %v674_v14  ;;  %651 = vmatpush1.bf16.msra.mxu1 %v674_v14 }
  0x1c   :  { %188 = vmatprep.subr.bf16.mxu0 %v675_v15  ;;  %644 = vmatprep.subr.bf16.mxu1 %v675_v15 }
  0x1f   :  { %189 = vmatpush1.bf16.msra.mxu0 %v677_v16  ;;  %652 = vmatpush1.bf16.msra.mxu1 %v677_v16 }
  0x22   :  { %207 = vmatmul.mubr.bf16.vlgmr.msra.gmra.mxu0 %v678_v17  ;;  %247 = vmatmul.mubr.bf16.vlgmr.msra.gmra.mxu1 %v679_v18 }
  0x23   :  { %216 = vmatprep.mubr.bf16.mxu0 %v686_v1  ;;  %256 = vmatprep.mubr.bf16.mxu1 %v686_v1 }
  0x2a   :  { %217 = vmatmul.mubr.bf16.gmra.mxu0 %v680_v19  ;;  %257 = vmatmul.mubr.bf16.gmra.mxu1 %v681_v20 }
  0x2b   :  { %226 = vmatprep.mubr.bf16.mxu0 %v686_v1  ;;  %266 = vmatprep.mubr.bf16.mxu1 %v686_v1 }
  0x32   :  { %227 = vmatmul.mubr.bf16.gmra.mxu0 %v682_v21  ;;  %267 = vmatmul.mubr.bf16.gmra.mxu1 %v683_v22 }
  0x33   :  { %236 = vmatprep.mubr.bf16.mxu0 %v686_v1  ;;  %276 = vmatprep.mubr.bf16.mxu1 %v686_v1 }
  0x3a   :  { %237 = vmatmul.mubr.bf16.gmra.mxu0 %v684_v23  ;;  %277 = vmatmul.mubr.bf16.gmra.mxu1 %v685_v24 }
  0xe2   :  { %v208_v25 = vpop.f32.mrf.mxu0  ;;  %v248_v26 = vpop.f32.mrf.mxu1 }
  0xe4   :  { %v210_v27 = vpop.f32.mrf.mxu0  ;;  %v250_v28 = vpop.f32.mrf.mxu1 }
  0xe6   :  { %v212_v29 = vpop.f32.mrf.mxu0  ;;  %v252_v30 = vpop.f32.mrf.mxu1 }
  0xe7   :  { %v546_v31 = vpack.c.bf16 %v212_v29, %v208_v25  ;;  %v566_v32 = vpack.c.bf16 %v252_v30, %v248_v26 }
  0xe8   :  { %v214_v33 = vpop.f32.mrf.mxu0  ;;  %v254_v34 = vpop.f32.mrf.mxu1 }
  0xe9   :  { %547 = vst [vmem:[%s837_s2] sm:$0xff] %v546_v31   ;;  %626 = vst [vmem:[%s837_s2 + $0x20] sm:$0xff] %v566_v32   ;;  %v586_v35 = vpack.c.bf16 %v214_v33, %v210_v27  ;;  %v606_v36 = vpack.c.bf16 %v254_v34, %v250_v28 }
  0xea   :  { %v218_v37 = vpop.f32.mrf.mxu0  ;;  %v258_v38 = vpop.f32.mrf.mxu1 }
  0xeb   :  { %587 = vst [vmem:[%s838_s3] sm:$0xff] %v586_v35   ;;  %633 = vst [vmem:[%s838_s3 + $0x20] sm:$0xff] %v606_v36  }
  0xec   :  { %v220_v39 = vpop.f32.mrf.mxu0  ;;  %v260_v40 = vpop.f32.mrf.mxu1 }
  0xee   :  { %v222_v41 = vpop.f32.mrf.mxu0  ;;  %v262_v42 = vpop.f32.mrf.mxu1 }
  0xef   :  { %v551_v43 = vpack.c.bf16 %v222_v41, %v218_v37  ;;  %v571_v44 = vpack.c.bf16 %v262_v42, %v258_v38 }
  0xf0   :  { %v224_v45 = vpop.f32.mrf.mxu0  ;;  %v264_v46 = vpop.f32.mrf.mxu1 }
  0xf1   :  { %623 = vst [vmem:[%s837_s2 + $0x8] sm:$0xff] %v551_v43   ;;  %627 = vst [vmem:[%s837_s2 + $0x28] sm:$0xff] %v571_v44   ;;  %v591_v47 = vpack.c.bf16 %v224_v45, %v220_v39  ;;  %v611_v48 = vpack.c.bf16 %v264_v46, %v260_v40 }
  0xf2   :  { %v228_v49 = vpop.f32.mrf.mxu0  ;;  %v268_v50 = vpop.f32.mrf.mxu1 }
  0xf3   :  { %630 = vst [vmem:[%s838_s3 + $0x8] sm:$0xff] %v591_v47   ;;  %634 = vst [vmem:[%s838_s3 + $0x28] sm:$0xff] %v611_v48  }
  0xf4   :  { %v230_v51 = vpop.f32.mrf.mxu0  ;;  %v270_v52 = vpop.f32.mrf.mxu1 }
  0xf6   :  { %v232_v53 = vpop.f32.mrf.mxu0  ;;  %v272_v54 = vpop.f32.mrf.mxu1 }
  0xf7   :  { %v556_v55 = vpack.c.bf16 %v232_v53, %v228_v49  ;;  %v576_v56 = vpack.c.bf16 %v272_v54, %v268_v50 }
  0xf8   :  { %v234_v57 = vpop.f32.mrf.mxu0  ;;  %v274_v58 = vpop.f32.mrf.mxu1 }
  0xf9   :  { %624 = vst [vmem:[%s837_s2 + $0x10] sm:$0xff] %v556_v55   ;;  %628 = vst [vmem:[%s837_s2 + $0x30] sm:$0xff] %v576_v56   ;;  %v596_v59 = vpack.c.bf16 %v234_v57, %v230_v51  ;;  %v616_v60 = vpack.c.bf16 %v274_v58, %v270_v52 }
  0xfa   :  { %v238_v61 = vpop.f32.mrf.mxu0  ;;  %v278_v62 = vpop.f32.mrf.mxu1 }
  0xfb   :  { %631 = vst [vmem:[%s838_s3 + $0x10] sm:$0xff] %v596_v59   ;;  %635 = vst [vmem:[%s838_s3 + $0x30] sm:$0xff] %v616_v60  }
  0xfc   :  { %v240_v63 = vpop.f32.mrf.mxu0  ;;  %v280_v0 = vpop.f32.mrf.mxu1 }
  0xfe   :  { %v242_v1 = vpop.f32.mrf.mxu0  ;;  %v282_v2 = vpop.f32.mrf.mxu1 }
  0xff   :  { %v561_v3 = vpack.c.bf16 %v242_v1, %v238_v61  ;;  %v581_v4 = vpack.c.bf16 %v282_v2, %v278_v62 }
 0x100   :  { %v244_v5 = vpop.f32.mrf.mxu0  ;;  %v284_v6 = vpop.f32.mrf.mxu1 }
 0x101   :  { %625 = vst [vmem:[%s837_s2 + $0x18] sm:$0xff] %v561_v3   ;;  %629 = vst [vmem:[%s837_s2 + $0x38] sm:$0xff] %v581_v4   ;;  %v601_v7 = vpack.c.bf16 %v244_v5, %v240_v63  ;;  %v621_v8 = vpack.c.bf16 %v284_v6, %v280_v0 }
 0x103   :  { %632 = vst [vmem:[%s838_s3 + $0x18] sm:$0xff] %v601_v7   ;;  %636 = vst [vmem:[%s838_s3 + $0x38] sm:$0xff] %v621_v8  }

// kernel: _lambda_.11
= control target key start
LH: loop header
LB: loop body
LE: loop exit
PB: predicated region body
PF: predicated region fallthrough
CT: control target
= control target key end

     0   :  { %v188_v0 = vmov 0.0   ;;  %vm189_vm0 = vmmov 0   ;;  %v117_v10 = vlaneseq  ;;  %s237_s1 = inlined_call_operand.vmem [shape: bf16[128,128], index: 1, kind: input, shape index: {}]   ;;  %s238_s0 = inlined_call_operand.vmem [shape: bf16[8,128], index: 0, kind: input, shape index: {}]   ;;  %s239_s2 = inlined_call_operand.vmem [shape: f32[8,128], index: 2, kind: output, shape index: {}]  }
   0x1   :  { %154 = vmatprep.subr.bf16.mxu0 %v188_v0  ;;  %v176_v1 = vld [vmem:[%s237_s1 + $0x38] sm:$0xff]   ;;  %170 = vmatprep.mubr.msk.bf16.mxu0 %vm189_vm0, %v188_v0  ;;  %v177_v2 = vld [vmem:[%s237_s1 + $0x30] sm:$0xff]   ;;  %v178_v3 = vld [vmem:[%s237_s1 + $0x28] sm:$0xff]  }
   0x2   :  { %155 = vmatpush3.bf16.msra.mxu0 %v176_v1  ;;  %v179_v4 = vld [vmem:[%s237_s1 + $0x20] sm:$0xff]   ;;  %v180_v5 = vld [vmem:[%s237_s1 + $0x18] sm:$0xff]   ;;  %v181_v6 = vld [vmem:[%s237_s1 + $0x10] sm:$0xff]   ;;  %v118_v11 = vand.u32 127, %v117_v10 }
   0x3   :  { %156 = vmatprep.subr.bf16.mxu0 %v188_v0  ;;  %v182_v7 = vld [vmem:[%s237_s1 + $0x8] sm:$0xff]   ;;  %v183_v8 = vld [vmem:[%s237_s1] sm:$0xff]  }
   0x4   :  { %v12_v9 = vld [vmem:[%s238_s0] sm:$0xf]  ;;  %vm119_vm1 = vcmp.lt.s32.totalorder %v118_v11, 2 }
   0x6   :  { %157 = vmatpush3.bf16.msra.mxu0 %v177_v2 }
   0x7   :  { %158 = vmatprep.subr.bf16.mxu0 %v188_v0 }
   0xa   :  { %159 = vmatpush3.bf16.msra.mxu0 %v178_v3 }
   0xb   :  { %160 = vmatprep.subr.bf16.mxu0 %v188_v0 }
   0xe   :  { %161 = vmatpush3.bf16.msra.mxu0 %v179_v4 }
   0xf   :  { %162 = vmatprep.subr.bf16.mxu0 %v188_v0 }
  0x12   :  { %163 = vmatpush3.bf16.msra.mxu0 %v180_v5 }
  0x13   :  { %164 = vmatprep.subr.bf16.mxu0 %v188_v0 }
  0x16   :  { %165 = vmatpush3.bf16.msra.mxu0 %v181_v6 }
  0x17   :  { %166 = vmatprep.subr.bf16.mxu0 %v188_v0 }
  0x1a   :  { %167 = vmatpush3.bf16.msra.mxu0 %v182_v7 }
  0x1b   :  { %168 = vmatprep.subr.bf16.mxu0 %v188_v0 }
  0x1e   :  { %169 = vmatpush3.bf16.msra.mxu0 %v183_v8 }
  0x21   :  { %171 = vmatmul.mubr.bf16.vlgmr.msra.gmra.mxu0 %v12_v9 }
  0xe1   :  { %v111_v12 = vpop.f32.mrf.mxu0 }
  0xe2   :  { %v120_v13 = vsel %vm119_vm1, %v111_v12, -1e+30 }
  0xe3   :  { %121 = vmax.xlane.f32.xlu0 %v120_v13  ;;  %v172_v14 = vpop.f32.mrf.mxu0 }
  0xe5   :  { %v114_v15 = vpop.f32.mrf.mxu0 }
  0xe7   :  { %v173_v16 = vpop.f32.mrf.mxu0 }
 0x16c   :  { %v122_v17 = vpop.xlane.xlu0 %121 }
 0x16d   :  { %v123_v18 = vsub.f32 %v120_v13, %v122_v17 }
 0x16f   :  { %v124_v19 = vmul.f32 1.442695, %v123_v18 }
 0x171   :  { %184 = vpow2.f32 %v124_v19 }
 0x17e   :  { %v185_v20 = vpop.eup %184 }
 0x17f   :  { %126 = vadd.xlane.f32.xlu0 %v185_v20 }
 0x208   :  { %v127_v21 = vpop.xlane.xlu0 %126 }
 0x209   :  { %186 = vlog2.f32 %v127_v21 }
 0x216   :  { %v187_v22 = vpop.eup %186 }
 0x217   :  { %v129_v23 = vmul.f32 0.6931472, %v187_v22 }
 0x219   :  { %v130_v24 = vsub.f32 %v123_v18, %v129_v23 }
 0x21b   :  { %v131_v25 = vsel %vm119_vm1, %v130_v24, 0.0 }
 0x21c   :  { %132 = vst [vmem:[%s239_s2] sm:$0xff] %v131_v25 }

// kernel: _lambda_.7
= control target key start
LH: loop header
LB: loop body
LE: loop exit
PB: predicated region body
PF: predicated region fallthrough
CT: control target
= control target key end

     0   :  { %v1142_v32 = vmov 0   ;;  %s1375_s1 = inlined_call_operand.vmem [shape: bf16[128,128], index: 1, kind: input, shape index: {}]   ;;  %s1376_s0 = inlined_call_operand.vmem [shape: bf16[128,128], index: 0, kind: input, shape index: {}]   ;;  %s1377_s4 = inlined_call_operand.vmem [shape: bf16[128,256], index: 4, kind: input, shape index: {}]   ;;  %s1378_s2 = inlined_call_operand.vmem [shape: bf16[128,128], index: 2, kind: input, shape index: {}]   ;;  %s1379_s3 = inlined_call_operand.vmem [shape: f32[1,128], index: 3, kind: input, shape index: {}]   ;;  %s1380_s5 = inlined_call_operand.vmem [shape: bf16[128,128], index: 5, kind: output, shape index: {0}]   ;;  %s1381_s6 = inlined_call_operand.vmem [shape: bf16[128,128], index: 6, kind: output, shape index: {1}]  }
   0x1   :  { %v1102_v0 = vld [vmem:[%s1375_s1 + $0x38] sm:$0xff]   ;;  %v1103_v1 = vld [vmem:[%s1375_s1 + $0x30] sm:$0xff]   ;;  %v1104_v2 = vld [vmem:[%s1375_s1 + $0x28] sm:$0xff]   ;;  %578 = vmatprep.mubr.bf16.mxu1 %v1142_v32 }
   0x2   :  { %1053 = vmatprep.subr.bf16.mxu0 %v1102_v0  ;;  %v1105_v3 = vld [vmem:[%s1375_s1 + $0x20] sm:$0xff]   ;;  %v1106_v5 = vld [vmem:[%s1375_s1 + $0x18] sm:$0xff]   ;;  %v1107_v6 = vld [vmem:[%s1375_s1 + $0x10] sm:$0xff]  }
   0x3   :  { %1054 = vmatpush3.bf16.msra.mxu0 %v1102_v0  ;;  %v1110_v4 = vld [vmem:[%s1376_s0] sm:$0xff]   ;;  %v1120_v7 = vld [vmem:[%s1377_s4 + $0x74] ss:$8 sps:$4 sm:$0xff]   ;;  %v1118_v8 = vld [vmem:[%s1377_s4 + $0x70] ss:$8 sps:$4 sm:$0xff]  }
   0x4   :  { %1055 = vmatprep.subr.bf16.mxu0 %v1103_v1  ;;  %1069 = vmatprep.mubr.bf16.mxu0 %v1110_v4  ;;  %v1123_v9 = vld [vmem:[%s1377_s4 + $0x64] ss:$8 sps:$4 sm:$0xff]   ;;  %v1121_v11 = vld [vmem:[%s1377_s4 + $0x60] ss:$8 sps:$4 sm:$0xff]   ;;  %v1126_v12 = vld [vmem:[%s1377_s4 + $0x54] ss:$8 sps:$4 sm:$0xff]  }
   0x5   :  { %1085 = vmatprep.subr.bf16.mxu1 %v1120_v7  ;;  %v1108_v10 = vld [vmem:[%s1375_s1 + $0x8] sm:$0xff]   ;;  %v1109_v13 = vld [vmem:[%s1375_s1] sm:$0xff]   ;;  %v1124_v14 = vld [vmem:[%s1377_s4 + $0x50] ss:$8 sps:$4 sm:$0xff]  }
   0x6   :  { %1093 = vmatpush1.bf16.msra.mxu1 %v1118_v8  ;;  %v1129_v15 = vld [vmem:[%s1377_s4 + $0x44] ss:$8 sps:$4 sm:$0xff]   ;;  %v1127_v17 = vld [vmem:[%s1377_s4 + $0x40] ss:$8 sps:$4 sm:$0xff]   ;;  %v1112_v18 = vld [vmem:[%s1376_s0 + $0x10] sm:$0xff]  }
   0x7   :  { %1056 = vmatpush3.bf16.msra.mxu0 %v1103_v1  ;;  %1086 = vmatprep.subr.bf16.mxu1 %v1123_v9  ;;  %v1111_v16 = vld [vmem:[%s1376_s0 + $0x8] sm:$0xff]   ;;  %v1132_v19 = vld [vmem:[%s1377_s4 + $0x34] ss:$8 sps:$4 sm:$0xff]   ;;  %v1130_v20 = vld [vmem:[%s1377_s4 + $0x30] ss:$8 sps:$4 sm:$0xff]  }
   0x8   :  { %1057 = vmatprep.subr.bf16.mxu0 %v1104_v2  ;;  %v1113_v21 = vld [vmem:[%s1376_s0 + $0x18] sm:$0xff]   ;;  %v1114_v22 = vld [vmem:[%s1376_s0 + $0x20] sm:$0xff]   ;;  %v1115_v23 = vld [vmem:[%s1376_s0 + $0x28] sm:$0xff]  }
   0x9   :  { %v1116_v24 = vld [vmem:[%s1376_s0 + $0x30] sm:$0xff]   ;;  %v1117_v25 = vld [vmem:[%s1376_s0 + $0x38] sm:$0xff]   ;;  %v1135_v26 = vld [vmem:[%s1377_s4 + $0x24] ss:$8 sps:$4 sm:$0xff]  }
   0xa   :  { %1094 = vmatpush1.bf16.msra.mxu1 %v1121_v11  ;;  %v1133_v27 = vld [vmem:[%s1377_s4 + $0x20] ss:$8 sps:$4 sm:$0xff]   ;;  %v1138_v28 = vld [vmem:[%s1377_s4 + $0x14] ss:$8 sps:$4 sm:$0xff]   ;;  %v1136_v29 = vld [vmem:[%s1377_s4 + $0x10] ss:$8 sps:$4 sm:$0xff]  }
   0xb   :  { %1058 = vmatpush3.bf16.msra.mxu0 %v1104_v2  ;;  %1087 = vmatprep.subr.bf16.mxu1 %v1126_v12  ;;  %v1141_v30 = vld [vmem:[%s1377_s4 + $0x4] ss:$8 sps:$4 sm:$0xff]   ;;  %v1139_v31 = vld [vmem:[%s1377_s4] ss:$8 sps:$4 sm:$0xff]   ;;  %v1017_v41 = vld [vmem:[%s1378_s2 + $0x10] sm:$0xff]  }
   0xc   :  { %1059 = vmatprep.subr.bf16.mxu0 %v1105_v3  ;;  %v905_v33 = vld [vmem:[%s1378_s2] sm:$0xff]   ;;  %v1016_v39 = vld [vmem:[%s1378_s2 + $0x8] sm:$0xff]   ;;  %v914_v48 = vunpack.c.l.bf16 %v1017_v41  ;;  %v915_v53 = vunpack.c.h.bf16 %v1017_v41  ;;  %v1018_v58 = vld [vmem:[%s1378_s2 + $0x18] sm:$0xff]  }
   0xd   :  { %v906_v34 = vunpack.c.l.bf16 %v905_v33  ;;  %v907_v38 = vunpack.c.h.bf16 %v905_v33  ;;  %v911_v42 = vunpack.c.h.bf16 %v1016_v39  ;;  %v1288_v43 = vld [vmem:[%s1379_s3] ss:$0 sm:$0xff]  ;;  %v910_v45 = vunpack.c.l.bf16 %v1016_v39  ;;  %v1021_v39 = vld [vmem:[%s1378_s2 + $0x30] sm:$0xff]  }
   0xe   :  { %1095 = vmatpush1.bf16.msra.mxu1 %v1124_v14  ;;  %v919_v62 = vunpack.c.h.bf16 %v1018_v58  ;;  %v918_v1 = vunpack.c.l.bf16 %v1018_v58  ;;  %v930_v41 = vunpack.c.l.bf16 %v1021_v39 }
   0xf   :  { %1060 = vmatpush3.bf16.msra.mxu0 %v1105_v3  ;;  %1088 = vmatprep.subr.bf16.mxu1 %v1129_v15 }
  0x10   :  { %1061 = vmatprep.subr.bf16.mxu0 %v1106_v5 }
  0x12   :  { %1096 = vmatpush1.bf16.msra.mxu1 %v1127_v17 }
  0x13   :  { %1062 = vmatpush3.bf16.msra.mxu0 %v1106_v5  ;;  %1089 = vmatprep.subr.bf16.mxu1 %v1132_v19 }
  0x14   :  { %1063 = vmatprep.subr.bf16.mxu0 %v1107_v6 }
  0x16   :  { %1097 = vmatpush1.bf16.msra.mxu1 %v1130_v20 }
  0x17   :  { %1064 = vmatpush3.bf16.msra.mxu0 %v1107_v6  ;;  %1090 = vmatprep.subr.bf16.mxu1 %v1135_v26 }
  0x18   :  { %1065 = vmatprep.subr.bf16.mxu0 %v1108_v10 }
  0x1a   :  { %1098 = vmatpush1.bf16.msra.mxu1 %v1133_v27 }
  0x1b   :  { %1066 = vmatpush3.bf16.msra.mxu0 %v1108_v10  ;;  %1091 = vmatprep.subr.bf16.mxu1 %v1138_v28 }
  0x1c   :  { %1067 = vmatprep.subr.bf16.mxu0 %v1109_v13 }
  0x1e   :  { %1099 = vmatpush1.bf16.msra.mxu1 %v1136_v29 }
  0x1f   :  { %1068 = vmatpush3.bf16.msra.mxu0 %v1109_v13  ;;  %1092 = vmatprep.subr.bf16.mxu1 %v1141_v30 }
  0x20   :  { %526 = vmatprep.subr.bf16.mxu0 %v1120_v7 }
  0x22   :  { %1070 = vmatmul.mubr.bf16.vlgmr.msra.gmra.mxu0 %v1111_v16  ;;  %1100 = vmatpush1.bf16.msra.mxu1 %v1139_v31 }
  0x23   :  { %1073 = vmatprep.mubr.bf16.mxu0 %v1112_v18  ;;  %527 = vmatpush1.bf16.msra.mxu0 %v1118_v8  ;;  %v1019_v8 = vld [vmem:[%s1378_s2 + $0x20] sm:$0xff]  }
  0x24   :  { %528 = vmatprep.subr.bf16.mxu0 %v1123_v9 }
  0x27   :  { %529 = vmatpush1.bf16.msra.mxu0 %v1121_v11 }
  0x28   :  { %530 = vmatprep.subr.bf16.mxu0 %v1126_v12 }
  0x2a   :  { %1074 = vmatmul.mubr.bf16.gmra.mxu0 %v1113_v21 }
  0x2b   :  { %1077 = vmatprep.mubr.bf16.mxu0 %v1114_v22  ;;  %531 = vmatpush1.bf16.msra.mxu0 %v1124_v14  ;;  %v922_v14 = vunpack.c.l.bf16 %v1019_v8 }
  0x2c   :  { %532 = vmatprep.subr.bf16.mxu0 %v1129_v15 }
  0x2f   :  { %533 = vmatpush1.bf16.msra.mxu0 %v1127_v17 }
  0x30   :  { %534 = vmatprep.subr.bf16.mxu0 %v1132_v19  ;;  %v923_v19 = vunpack.c.h.bf16 %v1019_v8 }
  0x32   :  { %1078 = vmatmul.mubr.bf16.gmra.mxu0 %v1115_v23  ;;  %v1020_v23 = vld [vmem:[%s1378_s2 + $0x28] sm:$0xff]  }
  0x33   :  { %1081 = vmatprep.mubr.bf16.mxu0 %v1116_v24  ;;  %535 = vmatpush1.bf16.msra.mxu0 %v1130_v20 }
  0x34   :  { %536 = vmatprep.subr.bf16.mxu0 %v1135_v26 }
  0x37   :  { %537 = vmatpush1.bf16.msra.mxu0 %v1133_v27 }
  0x38   :  { %538 = vmatprep.subr.bf16.mxu0 %v1138_v28  ;;  %v926_v28 = vunpack.c.l.bf16 %v1020_v23 }
  0x3a   :  { %1082 = vmatmul.mubr.bf16.gmra.mxu0 %v1117_v25 }
  0x3b   :  { %539 = vmatpush1.bf16.msra.mxu0 %v1136_v29  ;;  %558 = vmatprep.mubr.bf16.mxu0 %v1142_v32 }
  0x3c   :  { %540 = vmatprep.subr.bf16.mxu0 %v1141_v30  ;;  %v927_v30 = vunpack.c.h.bf16 %v1020_v23 }
  0x3f   :  { %541 = vmatpush1.bf16.msra.mxu0 %v1139_v31 }
  0xe2   :  { %v1071_v35 = vpop.f32.mrf.mxu0 }
  0xe3   :  { %v369_v54 = vadd.f32 %v1071_v35, %v910_v45 }
  0xe4   :  { %v221_v36 = vpop.f32.mrf.mxu0 }
  0xe5   :  { %v367_v37 = vadd.f32 %v906_v34, %v221_v36  ;;  %v392_v0 = vadd.f32 %v1288_v43, %v369_v54 }
  0xe6   :  { %v1072_v40 = vpop.f32.mrf.mxu0 }
  0xe7   :  { %v390_v46 = vadd.f32 %v1288_v43, %v367_v37  ;;  %v370_v50 = vadd.f32 %v1072_v40, %v911_v42  ;;  %v408_v10 = vmax.f32 %v392_v0, 0.0 }
  0xe8   :  { %v224_v44 = vpop.f32.mrf.mxu0 }
  0xe9   :  { %v368_v47 = vadd.f32 %v907_v38, %v224_v44  ;;  %v406_v55 = vmax.f32 %v390_v46, 0.0  ;;  %v393_v60 = vadd.f32 %v1288_v43, %v370_v50  ;;  %v931_v46 = vunpack.c.h.bf16 %v1021_v39  ;;  %v1022_v50 = vld [vmem:[%s1378_s2 + $0x38] sm:$0xff]  }
  0xea   :  { %v1075_v49 = vpop.f32.mrf.mxu0 }
  0xeb   :  { %v391_v51 = vadd.f32 %v1288_v43, %v368_v47  ;;  %v409_v5 = vmax.f32 %v393_v60, 0.0  ;;  %v373_v11 = vadd.f32 %v1075_v49, %v918_v1 }
  0xec   :  { %v237_v52 = vpop.f32.mrf.mxu0 }
  0xed   :  { %v407_v56 = vmax.f32 %v391_v51, 0.0  ;;  %v371_v57 = vadd.f32 %v914_v48, %v237_v52  ;;  %v423_v17 = vpack.c.bf16 %v409_v5, %v408_v10  ;;  %v396_v21 = vadd.f32 %v1288_v43, %v373_v11 }
  0xee   :  { %v1076_v59 = vpop.f32.mrf.mxu0 }
  0xef   :  { %v422_v61 = vpack.c.bf16 %v407_v56, %v406_v55  ;;  %v394_v2 = vadd.f32 %v1288_v43, %v371_v57  ;;  %v374_v6 = vadd.f32 %v1076_v59, %v919_v62  ;;  %v412_v27 = vmax.f32 %v396_v21, 0.0 }
  0xf0   :  { %v240_v63 = vpop.f32.mrf.mxu0  ;;  %v935_v55 = vunpack.c.h.bf16 %v1022_v50 }
  0xf1   :  { %v372_v3 = vadd.f32 %v915_v53, %v240_v63  ;;  %559 = vmatmul.mubr.bf16.vlgmr.msra.gmra.mxu0 %v422_v61  ;;  %v410_v12 = vmax.f32 %v394_v2, 0.0  ;;  %v397_v16 = vadd.f32 %v1288_v43, %v374_v6  ;;  %v934_v53 = vunpack.c.l.bf16 %v1022_v50 }
  0xf2   :  { %v1079_v4 = vpop.f32.mrf.mxu0  ;;  %568 = vmatprep.mubr.bf16.mxu0 %v1142_v32 }
  0xf3   :  { %v395_v7 = vadd.f32 %v1288_v43, %v372_v3  ;;  %v413_v22 = vmax.f32 %v397_v16, 0.0  ;;  %v377_v35 = vadd.f32 %v1079_v4, %v926_v28 }
  0xf4   :  { %v253_v9 = vpop.f32.mrf.mxu0 }
  0xf5   :  { %v411_v13 = vmax.f32 %v395_v7, 0.0  ;;  %v375_v24 = vadd.f32 %v922_v14, %v253_v9  ;;  %v425_v33 = vpack.c.bf16 %v413_v22, %v412_v27  ;;  %v400_v42 = vadd.f32 %v1288_v43, %v377_v35 }
  0xf6   :  { %v1080_v15 = vpop.f32.mrf.mxu0 }
  0xf7   :  { %v424_v18 = vpack.c.bf16 %v411_v13, %v410_v12  ;;  %v398_v29 = vadd.f32 %v1288_v43, %v375_v24  ;;  %v378_v37 = vadd.f32 %v1080_v15, %v927_v30  ;;  %v416_v48 = vmax.f32 %v400_v42, 0.0 }
  0xf8   :  { %v256_v20 = vpop.f32.mrf.mxu0 }
  0xf9   :  { %569 = vmatmul.mubr.bf16.gmra.mxu0 %v423_v17  ;;  %579 = vmatmul.mubr.bf16.vlgmr.msra.gmra.mxu1 %v424_v18  ;;  %v376_v25 = vadd.f32 %v923_v19, %v256_v20  ;;  %v414_v36 = vmax.f32 %v398_v29, 0.0  ;;  %v401_v44 = vadd.f32 %v1288_v43, %v378_v37 }
  0xfa   :  { %588 = vmatprep.mubr.bf16.mxu1 %v1142_v32  ;;  %v1083_v26 = vpop.f32.mrf.mxu0 }
  0xfb   :  { %v399_v31 = vadd.f32 %v1288_v43, %v376_v25  ;;  %v417_v49 = vmax.f32 %v401_v44, 0.0  ;;  %v381_v58 = vadd.f32 %v1083_v26, %v934_v53 }
  0xfc   :  { %v269_v34 = vpop.f32.mrf.mxu0 }
  0xfd   :  { %v415_v38 = vmax.f32 %v399_v31, 0.0  ;;  %v379_v51 = vadd.f32 %v930_v41, %v269_v34  ;;  %v427_v57 = vpack.c.bf16 %v417_v49, %v416_v48  ;;  %v404_v62 = vadd.f32 %v1288_v43, %v381_v58 }
  0xfe   :  { %v1084_v40 = vpop.f32.mrf.mxu0 }
  0xff   :  { %v426_v45 = vpack.c.bf16 %v415_v38, %v414_v36  ;;  %v402_v54 = vadd.f32 %v1288_v43, %v379_v51  ;;  %v382_v60 = vadd.f32 %v1084_v40, %v935_v55  ;;  %v420_v1 = vmax.f32 %v404_v62, 0.0 }
 0x100   :  { %v272_v47 = vpop.f32.mrf.mxu0 }
 0x101   :  { %589 = vmatmul.mubr.bf16.gmra.mxu1 %v425_v33  ;;  %v380_v52 = vadd.f32 %v931_v46, %v272_v47  ;;  %v418_v59 = vmax.f32 %v402_v54, 0.0  ;;  %v405_v63 = vadd.f32 %v1288_v43, %v382_v60 }
 0x102   :  { %598 = vmatprep.mubr.bf16.mxu1 %v1142_v32 }
 0x103   :  { %v403_v56 = vadd.f32 %v1288_v43, %v380_v52  ;;  %v421_v2 = vmax.f32 %v405_v63, 0.0 }
 0x105   :  { %v419_v61 = vmax.f32 %v403_v56, 0.0  ;;  %v429_v3 = vpack.c.bf16 %v421_v2, %v420_v1 }
 0x107   :  { %v428_v0 = vpack.c.bf16 %v419_v61, %v418_v59 }
 0x109   :  { %599 = vmatmul.mubr.bf16.gmra.mxu1 %v426_v45 }
 0x10a   :  { %608 = vmatprep.mubr.bf16.mxu1 %v1142_v32 }
 0x111   :  { %609 = vmatmul.mubr.bf16.gmra.mxu1 %v427_v57 }
 0x112   :  { %618 = vmatprep.mubr.bf16.mxu1 %v1142_v32 }
 0x119   :  { %619 = vmatmul.mubr.bf16.gmra.mxu1 %v428_v0 }
 0x11a   :  { %628 = vmatprep.mubr.bf16.mxu1 %v1142_v32 }
 0x121   :  { %629 = vmatmul.mubr.bf16.gmra.mxu1 %v429_v3 }
 0x1b1   :  { %v560_v4 = vpop.f32.mrf.mxu0 }
 0x1b3   :  { %v562_v5 = vpop.f32.mrf.mxu0 }
 0x1b5   :  { %v564_v6 = vpop.f32.mrf.mxu0 }
 0x1b6   :  { %v939_v7 = vpack.c.bf16 %v564_v6, %v560_v4 }
 0x1b7   :  { %v566_v8 = vpop.f32.mrf.mxu0 }
 0x1b8   :  { %940 = vst [vmem:[%s1380_s5] sm:$0xff] %v939_v7   ;;  %v979_v9 = vpack.c.bf16 %v566_v8, %v562_v5 }
 0x1b9   :  { %v570_v10 = vpop.f32.mrf.mxu0  ;;  %v580_v43 = vpop.f32.mrf.mxu1 }
 0x1ba   :  { %980 = vst [vmem:[%s1381_s6] sm:$0xff] %v979_v9  }
 0x1bb   :  { %v572_v32 = vpop.f32.mrf.mxu0  ;;  %v582_v11 = vpop.f32.mrf.mxu1 }
 0x1bd   :  { %v574_v12 = vpop.f32.mrf.mxu0  ;;  %v584_v13 = vpop.f32.mrf.mxu1 }
 0x1be   :  { %v944_v14 = vpack.c.bf16 %v574_v12, %v570_v10  ;;  %v949_v15 = vpack.c.bf16 %v584_v13, %v580_v43 }
 0x1bf   :  { %v576_v16 = vpop.f32.mrf.mxu0  ;;  %v586_v17 = vpop.f32.mrf.mxu1 }
 0x1c0   :  { %1023 = vst [vmem:[%s1380_s5 + $0x8] sm:$0xff] %v944_v14   ;;  %1024 = vst [vmem:[%s1380_s5 + $0x10] sm:$0xff] %v949_v15   ;;  %v984_v18 = vpack.c.bf16 %v576_v16, %v572_v32  ;;  %v989_v19 = vpack.c.bf16 %v586_v17, %v582_v11 }
 0x1c1   :  { %v590_v20 = vpop.f32.mrf.mxu1 }
 0x1c2   :  { %1030 = vst [vmem:[%s1381_s6 + $0x8] sm:$0xff] %v984_v18   ;;  %1031 = vst [vmem:[%s1381_s6 + $0x10] sm:$0xff] %v989_v19  }
 0x1c3   :  { %v592_v21 = vpop.f32.mrf.mxu1 }
 0x1c5   :  { %v594_v22 = vpop.f32.mrf.mxu1 }
 0x1c6   :  { %v954_v23 = vpack.c.bf16 %v594_v22, %v590_v20 }
 0x1c7   :  { %v596_v24 = vpop.f32.mrf.mxu1 }
 0x1c8   :  { %1025 = vst [vmem:[%s1380_s5 + $0x18] sm:$0xff] %v954_v23   ;;  %v994_v25 = vpack.c.bf16 %v596_v24, %v592_v21 }
 0x1c9   :  { %v600_v26 = vpop.f32.mrf.mxu1 }
 0x1ca   :  { %1032 = vst [vmem:[%s1381_s6 + $0x18] sm:$0xff] %v994_v25  }
 0x1cb   :  { %v602_v27 = vpop.f32.mrf.mxu1 }
 0x1cd   :  { %v604_v28 = vpop.f32.mrf.mxu1 }
 0x1ce   :  { %v959_v29 = vpack.c.bf16 %v604_v28, %v600_v26 }
 0x1cf   :  { %v606_v30 = vpop.f32.mrf.mxu1 }
 0x1d0   :  { %1026 = vst [vmem:[%s1380_s5 + $0x20] sm:$0xff] %v959_v29   ;;  %v999_v31 = vpack.c.bf16 %v606_v30, %v602_v27 }
 0x1d1   :  { %v610_v33 = vpop.f32.mrf.mxu1 }
 0x1d2   :  { %1033 = vst [vmem:[%s1381_s6 + $0x20] sm:$0xff] %v999_v31  }
 0x1d3   :  { %v612_v34 = vpop.f32.mrf.mxu1 }
 0x1d5   :  { %v614_v35 = vpop.f32.mrf.mxu1 }
 0x1d6   :  { %v964_v36 = vpack.c.bf16 %v614_v35, %v610_v33 }
 0x1d7   :  { %v616_v37 = vpop.f32.mrf.mxu1 }
 0x1d8   :  { %1027 = vst [vmem:[%s1380_s5 + $0x28] sm:$0xff] %v964_v36   ;;  %v1004_v38 = vpack.c.bf16 %v616_v37, %v612_v34 }
 0x1d9   :  { %v620_v39 = vpop.f32.mrf.mxu1 }
 0x1da   :  { %1034 = vst [vmem:[%s1381_s6 + $0x28] sm:$0xff] %v1004_v38  }
 0x1db   :  { %v622_v40 = vpop.f32.mrf.mxu1 }
 0x1dd   :  { %v624_v41 = vpop.f32.mrf.mxu1 }
 0x1de   :  { %v969_v42 = vpack.c.bf16 %v624_v41, %v620_v39 }
 0x1df   :  { %v626_v44 = vpop.f32.mrf.mxu1 }
 0x1e0   :  { %1028 = vst [vmem:[%s1380_s5 + $0x30] sm:$0xff] %v969_v42   ;;  %v1009_v45 = vpack.c.bf16 %v626_v44, %v622_v40 }
 0x1e1   :  { %v630_v46 = vpop.f32.mrf.mxu1 }
 0x1e2   :  { %1035 = vst [vmem:[%s1381_s6 + $0x30] sm:$0xff] %v1009_v45  }
 0x1e3   :  { %v632_v47 = vpop.f32.mrf.mxu1 }
 0x1e5   :  { %v634_v48 = vpop.f32.mrf.mxu1 }
 0x1e6   :  { %v974_v49 = vpack.c.bf16 %v634_v48, %v630_v46 }
 0x1e7   :  { %v636_v50 = vpop.f32.mrf.mxu1 }
 0x1e8   :  { %1029 = vst [vmem:[%s1380_s5 + $0x38] sm:$0xff] %v974_v49   ;;  %v1014_v51 = vpack.c.bf16 %v636_v50, %v632_v47 }
 0x1ea   :  { %1036 = vst [vmem:[%s1381_s6 + $0x38] sm:$0xff] %v1014_v51  }

// kernel: _lambda_.10
= control target key start
LH: loop header
LB: loop body
LE: loop exit
PB: predicated region body
PF: predicated region fallthrough
CT: control target
= control target key end

     0   :  { %s1395_s0 = inlined_call_operand.vmem [shape: bf16[128,128], index: 0, kind: input, shape index: {}]   ;;  %s1396_s1 = inlined_call_operand.vmem [shape: bf16[128,128], index: 1, kind: input, shape index: {}]   ;;  %s1397_s2 = inlined_call_operand.vmem [shape: bf16[128,128], index: 2, kind: input, shape index: {}]   ;;  %s1398_s3 = inlined_call_operand.vmem [shape: f32[1,128], index: 3, kind: input, shape index: {}]   ;;  %s1399_s4 = inlined_call_operand.vmem [shape: bf16[128,256], index: 4, kind: input, shape index: {}]   ;;  %s1400_s5 = inlined_call_operand.vmem [shape: bf16[128,128], index: 5, kind: output, shape index: {0}]   ;;  %s1401_s6 = inlined_call_operand.hbm [shape: bf16[128,128], index: 6, kind: output, shape index: {1}]  }
   0x1   :  { %v1118_v0 = vld [vmem:[%s1396_s1 + $0x38] sm:$0xff]   ;;  %v1119_v1 = vld [vmem:[%s1396_s1 + $0x30] sm:$0xff]   ;;  %v1120_v2 = vld [vmem:[%s1396_s1 + $0x28] sm:$0xff]  }
   0x2   :  { %1066 = vmatprep.subr.bf16.mxu0 %v1118_v0  ;;  %v1121_v3 = vld [vmem:[%s1396_s1 + $0x20] sm:$0xff]   ;;  %v1122_v5 = vld [vmem:[%s1396_s1 + $0x18] sm:$0xff]   ;;  %v1123_v6 = vld [vmem:[%s1396_s1 + $0x10] sm:$0xff]  }
   0x3   :  { %1067 = vmatpush3.bf16.msra.mxu0 %v1118_v0  ;;  %v1126_v4 = vld [vmem:[%s1395_s0] sm:$0xff]   ;;  %v1136_v7 = vld [vmem:[%s1399_s4 + $0x74] ss:$8 sps:$4 sm:$0xff]   ;;  %v1134_v8 = vld [vmem:[%s1399_s4 + $0x70] ss:$8 sps:$4 sm:$0xff]  }
   0x4   :  { %1068 = vmatprep.subr.bf16.mxu0 %v1119_v1  ;;  %1082 = vmatprep.mubr.bf16.mxu0 %v1126_v4  ;;  %v1139_v9 = vld [vmem:[%s1399_s4 + $0x64] ss:$8 sps:$4 sm:$0xff]   ;;  %v1137_v12 = vld [vmem:[%s1399_s4 + $0x60] ss:$8 sps:$4 sm:$0xff]   ;;  %v1142_v13 = vld [vmem:[%s1399_s4 + $0x54] ss:$8 sps:$4 sm:$0xff]  }
   0x5   :  { %1098 = vmatprep.subr.bf16.mxu1 %v1136_v7  ;;  %v1124_v10 = vld [vmem:[%s1396_s1 + $0x8] sm:$0xff]   ;;  %v1125_v11 = vld [vmem:[%s1396_s1] sm:$0xff]  }
   0x6   :  { %1106 = vmatpush1.bf16.msra.mxu1 %v1134_v8 }
   0x7   :  { %1069 = vmatpush3.bf16.msra.mxu0 %v1119_v1  ;;  %1099 = vmatprep.subr.bf16.mxu1 %v1139_v9 }
   0x8   :  { %1070 = vmatprep.subr.bf16.mxu0 %v1120_v2 }
   0xa   :  { %1107 = vmatpush1.bf16.msra.mxu1 %v1137_v12 }
   0xb   :  { %1071 = vmatpush3.bf16.msra.mxu0 %v1120_v2 }
   0xc   :  { %1072 = vmatprep.subr.bf16.mxu0 %v1121_v3 }
   0xf   :  { %1073 = vmatpush3.bf16.msra.mxu0 %v1121_v3 }
  0x10   :  { %1074 = vmatprep.subr.bf16.mxu0 %v1122_v5 }
  0x13   :  { %1075 = vmatpush3.bf16.msra.mxu0 %v1122_v5 }
  0x14   :  { %1076 = vmatprep.subr.bf16.mxu0 %v1123_v6 }
  0x17   :  { %1077 = vmatpush3.bf16.msra.mxu0 %v1123_v6 }
  0x18   :  { %1078 = vmatprep.subr.bf16.mxu0 %v1124_v10 }
  0x19   :  { %12 = vsyncpa [#allocation4], 0  ;;  %1100 = vmatprep.subr.bf16.mxu1 %v1142_v13  ;;  %v1140_v14 = vld [vmem:[%s1399_s4 + $0x50] ss:$8 sps:$4 sm:$0xff]   ;;  %v1145_v15 = vld [vmem:[%s1399_s4 + $0x44] ss:$8 sps:$4 sm:$0xff]  }
  0x1a   :  { %1108 = vmatpush1.bf16.msra.mxu1 %v1140_v14  ;;  %v1127_v16 = vld [vmem:[%s1395_s0 + $0x8] sm:$0xff]   ;;  %v1128_v18 = vld [vmem:[%s1395_s0 + $0x10] sm:$0xff]   ;;  %v1129_v21 = vld [vmem:[%s1395_s0 + $0x18] sm:$0xff]   ;;  %v1180_v32 = vmov 0  }
  0x1b   :  { %1079 = vmatpush3.bf16.msra.mxu0 %v1124_v10  ;;  %1101 = vmatprep.subr.bf16.mxu1 %v1145_v15  ;;  %v1143_v17 = vld [vmem:[%s1399_s4 + $0x40] ss:$8 sps:$4 sm:$0xff]   ;;  %v1148_v19 = vld [vmem:[%s1399_s4 + $0x34] ss:$8 sps:$4 sm:$0xff]   ;;  %v1146_v20 = vld [vmem:[%s1399_s4 + $0x30] ss:$8 sps:$4 sm:$0xff]  }
  0x1c   :  { %1080 = vmatprep.subr.bf16.mxu0 %v1125_v11  ;;  %v1130_v22 = vld [vmem:[%s1395_s0 + $0x20] sm:$0xff]   ;;  %v1131_v23 = vld [vmem:[%s1395_s0 + $0x28] sm:$0xff]   ;;  %v1132_v24 = vld [vmem:[%s1395_s0 + $0x30] sm:$0xff]   ;;  %579 = vmatprep.mubr.bf16.mxu1 %v1180_v32 }
  0x1d   :  { %v1133_v25 = vld [vmem:[%s1395_s0 + $0x38] sm:$0xff]   ;;  %v1151_v26 = vld [vmem:[%s1399_s4 + $0x24] ss:$8 sps:$4 sm:$0xff]   ;;  %v1149_v27 = vld [vmem:[%s1399_s4 + $0x20] ss:$8 sps:$4 sm:$0xff]  }
  0x1e   :  { %1109 = vmatpush1.bf16.msra.mxu1 %v1143_v17  ;;  %v1154_v28 = vld [vmem:[%s1399_s4 + $0x14] ss:$8 sps:$4 sm:$0xff]   ;;  %v1152_v29 = vld [vmem:[%s1399_s4 + $0x10] ss:$8 sps:$4 sm:$0xff]   ;;  %v1157_v30 = vld [vmem:[%s1399_s4 + $0x4] ss:$8 sps:$4 sm:$0xff]  }
  0x1f   :  { %1081 = vmatpush3.bf16.msra.mxu0 %v1125_v11  ;;  %1102 = vmatprep.subr.bf16.mxu1 %v1148_v19  ;;  %v1155_v31 = vld [vmem:[%s1399_s4] ss:$8 sps:$4 sm:$0xff]   ;;  %v1030_v41 = vld [vmem:[%s1397_s2 + $0x10] sm:$0xff]   ;;  %v1031_v58 = vld [vmem:[%s1397_s2 + $0x18] sm:$0xff]   ;;  %s1181_s4 = smov [#allocation3]  }
  0x20   :  { %527 = vmatprep.subr.bf16.mxu0 %v1136_v7  ;;  %v918_v33 = vld [vmem:[%s1397_s2] sm:$0xff]   ;;  %v1029_v39 = vld [vmem:[%s1397_s2 + $0x8] sm:$0xff]   ;;  %v927_v48 = vunpack.c.l.bf16 %v1030_v41  ;;  %v928_v53 = vunpack.c.h.bf16 %v1030_v41  ;;  %v932_v62 = vunpack.c.h.bf16 %v1031_v58  ;;  %v931_v1 = vunpack.c.l.bf16 %v1031_v58  ;;  %s807_s13 = sshll.u32 %s1181_s4, 4  ;;  %s808_s13 = int_to_ptr.vmem [resolvable:$true] %s807_s13 }
  0x21   :  { %v919_v34 = vunpack.c.l.bf16 %v918_v33  ;;  %v920_v38 = vunpack.c.h.bf16 %v918_v33  ;;  %v924_v42 = vunpack.c.h.bf16 %v1029_v39  ;;  %v1329_v43 = vld [vmem:[%s1398_s3] ss:$0 sm:$0xff]  ;;  %v923_v45 = vunpack.c.l.bf16 %v1029_v39  ;;  %v1034_v39 = vld [vmem:[%s1397_s2 + $0x30] sm:$0xff]   ;;  %s1158_s16 = scalar_lea.vmem %s808_s13, 1024  ;;  %p1163_p1 = scmp.lt.s32.totalorder %s808_s13, %s808_s13 }
  0x22   :  { %1083 = vmatmul.mubr.bf16.vlgmr.msra.gmra.mxu0 %v1127_v16  ;;  %1110 = vmatpush1.bf16.msra.mxu1 %v1146_v20  ;;  %v943_v41 = vunpack.c.l.bf16 %v1034_v39  ;;  %p1159_p0 = scmp.ne.s32.totalorder %s808_s13, %s1158_s16  ;;  %p1164_p2 = scmp.lt.s32.totalorder %s1158_s16, %s1158_s16 }
  0x23   :  { %1086 = vmatprep.mubr.bf16.mxu0 %v1128_v18  ;;  %528 = vmatpush1.bf16.msra.mxu0 %v1134_v8  ;;  %v1032_v8 = vld [vmem:[%s1397_s2 + $0x20] sm:$0xff]  }
  0x24   :  { %529 = vmatprep.subr.bf16.mxu0 %v1139_v9  ;;  %1103 = vmatprep.subr.bf16.mxu1 %v1151_v26  ;;  %p1165_p3 = por %p1164_p2, %p1163_p1 }
  0x26   :  { %1111 = vmatpush1.bf16.msra.mxu1 %v1149_v27  ;;  %p1166_p4 = pnand %p1165_p3, %p1159_p0 }
  0x27   :  { %530 = vmatpush1.bf16.msra.mxu0 %v1137_v12  ;;  %1104 = vmatprep.subr.bf16.mxu1 %v1154_v28 }
  0x28   :  { %531 = vmatprep.subr.bf16.mxu0 %v1142_v13 }
  0x2a   :  { %1087 = vmatmul.mubr.bf16.gmra.mxu0 %v1129_v21  ;;  %1112 = vmatpush1.bf16.msra.mxu1 %v1152_v29 }
  0x2b   :  { %1090 = vmatprep.mubr.bf16.mxu0 %v1130_v22  ;;  %532 = vmatpush1.bf16.msra.mxu0 %v1140_v14  ;;  %v935_v14 = vunpack.c.l.bf16 %v1032_v8 }
  0x2c   :  { %533 = vmatprep.subr.bf16.mxu0 %v1145_v15  ;;  %1105 = vmatprep.subr.bf16.mxu1 %v1157_v30 }
  0x2e   :  { %1113 = vmatpush1.bf16.msra.mxu1 %v1155_v31 }
  0x2f   :  { %534 = vmatpush1.bf16.msra.mxu0 %v1143_v17 }
  0x30   :  { %535 = vmatprep.subr.bf16.mxu0 %v1148_v19  ;;  %v936_v19 = vunpack.c.h.bf16 %v1032_v8 }
  0x32   :  { %1091 = vmatmul.mubr.bf16.gmra.mxu0 %v1131_v23  ;;  %v1033_v23 = vld [vmem:[%s1397_s2 + $0x28] sm:$0xff]  }
  0x33   :  { %1094 = vmatprep.mubr.bf16.mxu0 %v1132_v24  ;;  %536 = vmatpush1.bf16.msra.mxu0 %v1146_v20 }
  0x34   :  { %537 = vmatprep.subr.bf16.mxu0 %v1151_v26 }
  0x37   :  { %538 = vmatpush1.bf16.msra.mxu0 %v1149_v27 }
  0x38   :  { %539 = vmatprep.subr.bf16.mxu0 %v1154_v28  ;;  %v939_v28 = vunpack.c.l.bf16 %v1033_v23 }
  0x3a   :  { %1095 = vmatmul.mubr.bf16.gmra.mxu0 %v1133_v25 }
  0x3b   :  { %540 = vmatpush1.bf16.msra.mxu0 %v1152_v29  ;;  %559 = vmatprep.mubr.bf16.mxu0 %v1180_v32 }
  0x3c   :  { %541 = vmatprep.subr.bf16.mxu0 %v1157_v30  ;;  %v940_v30 = vunpack.c.h.bf16 %v1033_v23 }
  0x3f   :  { %542 = vmatpush1.bf16.msra.mxu0 %v1155_v31 }
  0xe2   :  { %v1084_v35 = vpop.f32.mrf.mxu0 }
  0xe3   :  { %v370_v54 = vadd.f32 %v1084_v35, %v923_v45 }
  0xe4   :  { %v222_v36 = vpop.f32.mrf.mxu0 }
  0xe5   :  { %v368_v37 = vadd.f32 %v919_v34, %v222_v36  ;;  %v393_v0 = vadd.f32 %v1329_v43, %v370_v54 }
  0xe6   :  { %v1085_v40 = vpop.f32.mrf.mxu0 }
  0xe7   :  { %v391_v46 = vadd.f32 %v1329_v43, %v368_v37  ;;  %v371_v50 = vadd.f32 %v1085_v40, %v924_v42  ;;  %v409_v10 = vmax.f32 %v393_v0, 0.0 }
  0xe8   :  { %v225_v44 = vpop.f32.mrf.mxu0 }
  0xe9   :  { %v369_v47 = vadd.f32 %v920_v38, %v225_v44  ;;  %v407_v55 = vmax.f32 %v391_v46, 0.0  ;;  %v394_v60 = vadd.f32 %v1329_v43, %v371_v50  ;;  %v944_v46 = vunpack.c.h.bf16 %v1034_v39  ;;  %v1035_v50 = vld [vmem:[%s1397_s2 + $0x38] sm:$0xff]  }
  0xea   :  { %v1088_v49 = vpop.f32.mrf.mxu0 }
  0xeb   :  { %v392_v51 = vadd.f32 %v1329_v43, %v369_v47  ;;  %v410_v5 = vmax.f32 %v394_v60, 0.0  ;;  %v374_v11 = vadd.f32 %v1088_v49, %v931_v1 }
  0xec   :  { %v238_v52 = vpop.f32.mrf.mxu0 }
  0xed   :  { %v408_v56 = vmax.f32 %v392_v51, 0.0  ;;  %v372_v57 = vadd.f32 %v927_v48, %v238_v52  ;;  %v424_v17 = vpack.c.bf16 %v410_v5, %v409_v10  ;;  %v397_v21 = vadd.f32 %v1329_v43, %v374_v11 }
  0xee   :  { %v1089_v59 = vpop.f32.mrf.mxu0 }
  0xef   :  { %v423_v61 = vpack.c.bf16 %v408_v56, %v407_v55  ;;  %v395_v2 = vadd.f32 %v1329_v43, %v372_v57  ;;  %v375_v6 = vadd.f32 %v1089_v59, %v932_v62  ;;  %v413_v27 = vmax.f32 %v397_v21, 0.0 }
  0xf0   :  { %v241_v63 = vpop.f32.mrf.mxu0  ;;  %v948_v55 = vunpack.c.h.bf16 %v1035_v50 }
  0xf1   :  { %v373_v3 = vadd.f32 %v928_v53, %v241_v63  ;;  %560 = vmatmul.mubr.bf16.vlgmr.msra.gmra.mxu0 %v423_v61  ;;  %v411_v12 = vmax.f32 %v395_v2, 0.0  ;;  %v398_v16 = vadd.f32 %v1329_v43, %v375_v6  ;;  %v947_v53 = vunpack.c.l.bf16 %v1035_v50 }
  0xf2   :  { %v1092_v4 = vpop.f32.mrf.mxu0  ;;  %569 = vmatprep.mubr.bf16.mxu0 %v1180_v32 }
  0xf3   :  { %v396_v7 = vadd.f32 %v1329_v43, %v373_v3  ;;  %v414_v22 = vmax.f32 %v398_v16, 0.0  ;;  %v378_v35 = vadd.f32 %v1092_v4, %v939_v28 }
  0xf4   :  { %v254_v9 = vpop.f32.mrf.mxu0 }
  0xf5   :  { %v412_v13 = vmax.f32 %v396_v7, 0.0  ;;  %v376_v24 = vadd.f32 %v935_v14, %v254_v9  ;;  %v426_v33 = vpack.c.bf16 %v414_v22, %v413_v27  ;;  %v401_v42 = vadd.f32 %v1329_v43, %v378_v35 }
  0xf6   :  { %v1093_v15 = vpop.f32.mrf.mxu0 }
  0xf7   :  { %v425_v18 = vpack.c.bf16 %v412_v13, %v411_v12  ;;  %v399_v29 = vadd.f32 %v1329_v43, %v376_v24  ;;  %v379_v37 = vadd.f32 %v1093_v15, %v940_v30  ;;  %v417_v48 = vmax.f32 %v401_v42, 0.0 }
  0xf8   :  { %v257_v20 = vpop.f32.mrf.mxu0 }
  0xf9   :  { %570 = vmatmul.mubr.bf16.gmra.mxu0 %v424_v17  ;;  %580 = vmatmul.mubr.bf16.vlgmr.msra.gmra.mxu1 %v425_v18  ;;  %v377_v25 = vadd.f32 %v936_v19, %v257_v20  ;;  %v415_v36 = vmax.f32 %v399_v29, 0.0  ;;  %v402_v44 = vadd.f32 %v1329_v43, %v379_v37 }
  0xfa   :  { %589 = vmatprep.mubr.bf16.mxu1 %v1180_v32  ;;  %v1096_v26 = vpop.f32.mrf.mxu0 }
  0xfb   :  { %v400_v31 = vadd.f32 %v1329_v43, %v377_v25  ;;  %v418_v49 = vmax.f32 %v402_v44, 0.0  ;;  %v382_v58 = vadd.f32 %v1096_v26, %v947_v53 }
  0xfc   :  { %v270_v34 = vpop.f32.mrf.mxu0 }
  0xfd   :  { %v416_v38 = vmax.f32 %v400_v31, 0.0  ;;  %v380_v51 = vadd.f32 %v943_v41, %v270_v34  ;;  %v428_v57 = vpack.c.bf16 %v418_v49, %v417_v48  ;;  %v405_v62 = vadd.f32 %v1329_v43, %v382_v58 }
  0xfe   :  { %v1097_v40 = vpop.f32.mrf.mxu0 }
  0xff   :  { %v427_v45 = vpack.c.bf16 %v416_v38, %v415_v36  ;;  %v403_v54 = vadd.f32 %v1329_v43, %v380_v51  ;;  %v383_v60 = vadd.f32 %v1097_v40, %v948_v55  ;;  %v421_v1 = vmax.f32 %v405_v62, 0.0 }
 0x100   :  { %v273_v47 = vpop.f32.mrf.mxu0 }
 0x101   :  { %590 = vmatmul.mubr.bf16.gmra.mxu1 %v426_v33  ;;  %v381_v52 = vadd.f32 %v944_v46, %v273_v47  ;;  %v419_v59 = vmax.f32 %v403_v54, 0.0  ;;  %v406_v63 = vadd.f32 %v1329_v43, %v383_v60 }
 0x102   :  { %599 = vmatprep.mubr.bf16.mxu1 %v1180_v32 }
 0x103   :  { %v404_v56 = vadd.f32 %v1329_v43, %v381_v52  ;;  %v422_v2 = vmax.f32 %v406_v63, 0.0 }
 0x105   :  { %v420_v61 = vmax.f32 %v404_v56, 0.0  ;;  %v430_v3 = vpack.c.bf16 %v422_v2, %v421_v1 }
 0x107   :  { %v429_v0 = vpack.c.bf16 %v420_v61, %v419_v59 }
 0x109   :  { %600 = vmatmul.mubr.bf16.gmra.mxu1 %v427_v45 }
 0x10a   :  { %609 = vmatprep.mubr.bf16.mxu1 %v1180_v32 }
 0x111   :  { %610 = vmatmul.mubr.bf16.gmra.mxu1 %v428_v57 }
 0x112   :  { %619 = vmatprep.mubr.bf16.mxu1 %v1180_v32 }
 0x119   :  { %620 = vmatmul.mubr.bf16.gmra.mxu1 %v429_v0 }
 0x11a   :  { %629 = vmatprep.mubr.bf16.mxu1 %v1180_v32 }
 0x121   :  { %630 = vmatmul.mubr.bf16.gmra.mxu1 %v430_v3 }
 0x1b1   :  { %v561_v4 = vpop.f32.mrf.mxu0 }
 0x1b3   :  { %v563_v5 = vpop.f32.mrf.mxu0 }
 0x1b5   :  { %v565_v6 = vpop.f32.mrf.mxu0 }
 0x1b6   :  { %v952_v7 = vpack.c.bf16 %v565_v6, %v561_v4 }
 0x1b7   :  { %v567_v8 = vpop.f32.mrf.mxu0 }
 0x1b8   :  { %953 = vst [vmem:[%s1400_s5] sm:$0xff] %v952_v7   ;;  %v992_v9 = vpack.c.bf16 %v567_v8, %v563_v5 }
 0x1b9   :  { %v571_v10 = vpop.f32.mrf.mxu0  ;;  %v581_v43 = vpop.f32.mrf.mxu1 }
 0x1ba   :  { %993 = vst [vmem:[#allocation3] sm:$0xff] %v992_v9  }
 0x1bb   :  { %v573_v11 = vpop.f32.mrf.mxu0  ;;  %v583_v12 = vpop.f32.mrf.mxu1 }
 0x1bd   :  { %v575_v32 = vpop.f32.mrf.mxu0  ;;  %v585_v13 = vpop.f32.mrf.mxu1 }
 0x1be   :  { %v957_v14 = vpack.c.bf16 %v575_v32, %v571_v10  ;;  %v962_v15 = vpack.c.bf16 %v585_v13, %v581_v43 }
 0x1bf   :  { %v577_v16 = vpop.f32.mrf.mxu0  ;;  %v587_v17 = vpop.f32.mrf.mxu1 }
 0x1c0   :  { %1036 = vst [vmem:[%s1400_s5 + $0x8] sm:$0xff] %v957_v14   ;;  %1037 = vst [vmem:[%s1400_s5 + $0x10] sm:$0xff] %v962_v15   ;;  %v997_v18 = vpack.c.bf16 %v577_v16, %v573_v11  ;;  %v1002_v19 = vpack.c.bf16 %v587_v17, %v583_v12 }
 0x1c1   :  { %v591_v20 = vpop.f32.mrf.mxu1 }
 0x1c2   :  { %1043 = vst [vmem:[#allocation3 + $0x8] sm:$0xff] %v997_v18   ;;  %1044 = vst [vmem:[#allocation3 + $0x10] sm:$0xff] %v1002_v19  }
 0x1c3   :  { %v593_v21 = vpop.f32.mrf.mxu1 }
 0x1c5   :  { %v595_v22 = vpop.f32.mrf.mxu1 }
 0x1c6   :  { %v967_v23 = vpack.c.bf16 %v595_v22, %v591_v20 }
 0x1c7   :  { %v597_v24 = vpop.f32.mrf.mxu1 }
 0x1c8   :  { %1038 = vst [vmem:[%s1400_s5 + $0x18] sm:$0xff] %v967_v23   ;;  %v1007_v25 = vpack.c.bf16 %v597_v24, %v593_v21 }
 0x1c9   :  { %v601_v26 = vpop.f32.mrf.mxu1 }
 0x1ca   :  { %1045 = vst [vmem:[#allocation3 + $0x18] sm:$0xff] %v1007_v25  }
 0x1cb   :  { %v603_v27 = vpop.f32.mrf.mxu1 }
 0x1cd   :  { %v605_v28 = vpop.f32.mrf.mxu1 }
 0x1ce   :  { %v972_v29 = vpack.c.bf16 %v605_v28, %v601_v26 }
 0x1cf   :  { %v607_v30 = vpop.f32.mrf.mxu1 }
 0x1d0   :  { %1039 = vst [vmem:[%s1400_s5 + $0x20] sm:$0xff] %v972_v29   ;;  %v1012_v31 = vpack.c.bf16 %v607_v30, %v603_v27 }
 0x1d1   :  { %v611_v33 = vpop.f32.mrf.mxu1 }
 0x1d2   :  { %1046 = vst [vmem:[#allocation3 + $0x20] sm:$0xff] %v1012_v31  }
 0x1d3   :  { %v613_v34 = vpop.f32.mrf.mxu1 }
 0x1d5   :  { %v615_v35 = vpop.f32.mrf.mxu1 }
 0x1d6   :  { %v977_v36 = vpack.c.bf16 %v615_v35, %v611_v33 }
 0x1d7   :  { %v617_v37 = vpop.f32.mrf.mxu1 }
 0x1d8   :  { %1040 = vst [vmem:[%s1400_s5 + $0x28] sm:$0xff] %v977_v36   ;;  %v1017_v38 = vpack.c.bf16 %v617_v37, %v613_v34 }
 0x1d9   :  { %v621_v39 = vpop.f32.mrf.mxu1 }
 0x1da   :  { %1047 = vst [vmem:[#allocation3 + $0x28] sm:$0xff] %v1017_v38  }
 0x1db   :  { %v623_v40 = vpop.f32.mrf.mxu1 }
 0x1dd   :  { %v625_v41 = vpop.f32.mrf.mxu1 }
 0x1de   :  { %v982_v42 = vpack.c.bf16 %v625_v41, %v621_v39 }
 0x1df   :  { %v627_v44 = vpop.f32.mrf.mxu1 }
 0x1e0   :  { %1041 = vst [vmem:[%s1400_s5 + $0x30] sm:$0xff] %v982_v42   ;;  %v1022_v45 = vpack.c.bf16 %v627_v44, %v623_v40 }
 0x1e1   :  { %v631_v46 = vpop.f32.mrf.mxu1 }
 0x1e2   :  { %1048 = vst [vmem:[#allocation3 + $0x30] sm:$0xff] %v1022_v45  }
 0x1e3   :  { %v633_v47 = vpop.f32.mrf.mxu1 }
 0x1e5   :  { %v635_v48 = vpop.f32.mrf.mxu1 }
 0x1e6   :  { %v987_v49 = vpack.c.bf16 %v635_v48, %v631_v46 }
 0x1e7   :  { %v637_v50 = vpop.f32.mrf.mxu1 }
 0x1e8   :  { %1042 = vst [vmem:[%s1400_s5 + $0x38] sm:$0xff] %v987_v49   ;;  %v1027_v51 = vpack.c.bf16 %v637_v50, %v633_v47 }
 0x1ea   :  { %1049 = vst [vmem:[#allocation3 + $0x38] sm:$0xff] %v1027_v51  }
 0x1eb   :  { %1169 = shalt.err (!%p1166_p4)
}
 0x1ec   :  { %s1182_s17 = smov 64   ;;  %s1183_s18 = smov 4  }
 0x1ed   :  { %813 = dma.vmem_to_hbm [thread:$0]  %s808_s13, 1024, %s1401_s6, [#allocation4], %s1182_s17, %s1182_s17, %s1183_s18  }
 0x1ee   :  { %1178 = dma.done.wait [#allocation4], 1024  }
 0x1ef   :  { %1179 = vsyncadd [#allocation4], 4294966272 }
 0x1f0   :  { %819 = vsyncpa [#allocation4], 1 }

</bundles_post_ra>
